<compile_context>
chip_gen: v5e
topology: v5e:2x2
jax: 0.10.0
libtpu: 0.0.40
codegen_flags: <defaults>
</compile_context>

<pallas_src>
import math
import functools

import jax
import jax.numpy as jnp
from jax.experimental import pallas as pl
from jax.experimental.pallas import tpu as pltpu


def _layernorm(x, gamma, beta, eps=1e-5):
    """LayerNorm over the last axis, f32 math, biased variance (PyTorch)."""
    mu = jnp.mean(x, axis=-1, keepdims=True)
    var = jnp.mean((x - mu) ** 2, axis=-1, keepdims=True)
    return (x - mu) * jax.lax.rsqrt(var + eps) * gamma + beta


def _encoder_stack_kernel(x_ref, *refs, nhead, use_final_norm, has_mask):
    """Applies ONE shared encoder layer; the grid's last axis = layer index."""
    if has_mask:
        mask_ref = refs[0]
        refs = refs[1:]
    (wqkv_ref, bqkv_ref, wo_ref, bo_ref,
     w1_ref, b1_ref, w2_ref, b2_ref,
     g1_ref, be1_ref, g2_ref, be2_ref,
     gn_ref, bn_ref,
     o_ref,
     acc_ref, q_scr, k_scr, v_scr, attn_scr) = refs

    Bt, S, D = x_ref.shape
    M = Bt * S
    dh = D // nhead
    scale = 1.0 / math.sqrt(dh)

    layer = pl.program_id(1)
    num_layers = pl.num_programs(1)

    # Load the input activations into the resident f32 accumulator once per
    # batch block; it stays in VMEM across the whole layer axis.
    @pl.when(layer == 0)
    def _():
        acc_ref[...] = x_ref[...].astype(jnp.float32)

    x3 = acc_ref[...]                                     # (Bt, S, D) f32
    x2 = x3.reshape(M, D)                                 # free view when S % 8 == 0
    x_bf = x2.astype(jnp.bfloat16)

    # ---- fused QKV projection: one big MXU matmul over all Bt*S rows ----
    qkv = jnp.dot(x_bf, wqkv_ref[...],
                  preferred_element_type=jnp.float32) + bqkv_ref[...]   # (M, 3D)

    # ---- split heads into a LEADING batch dim (G = nhead*Bt) via VMEM
    # scratch stores at static offsets (no in-kernel transpose needed) ----
    for h in range(nhead):
        lo = h * dh
        q_scr[h * Bt:(h + 1) * Bt] = (
            (qkv[:, lo:lo + dh] * scale).reshape(Bt, S, dh).astype(jnp.bfloat16))
        k_scr[h * Bt:(h + 1) * Bt] = (
            qkv[:, D + lo:D + lo + dh].reshape(Bt, S, dh).astype(jnp.bfloat16))
        v_scr[h * Bt:(h + 1) * Bt] = (
            qkv[:, 2 * D + lo:2 * D + lo + dh].reshape(Bt, S, dh)
            .astype(jnp.bfloat16))

    q = q_scr[...]                                        # (G, S, dh) bf16
    k = k_scr[...]
    v = v_scr[...]

    # scores: ONE batched dot_general, contracting dh (K in native layout)
    s = jax.lax.dot_general(q, k, (((2,), (2,)), ((0,), (0,))),
                            preferred_element_type=jnp.float32)          # (G,S,S)
    if has_mask:
        s = s + mask_ref[...].astype(jnp.float32)         # (S,S) broadcasts over G
    s = s - jnp.max(s, axis=-1, keepdims=True)
    p = jnp.exp(s)
    p = p * pl.reciprocal(jnp.sum(p, axis=-1, keepdims=True), approx=True)

    o = jax.lax.dot_general(p.astype(jnp.bfloat16), v,
                            (((2,), (1,)), ((0,), (0,))),
                            preferred_element_type=jnp.float32)          # (G,S,dh)

    # ---- re-assemble heads along the lane axis (static-offset stores) so the
    # output projection is ONE full-contraction (M, D) @ (D, D) GEMM ----
    for h in range(nhead):
        attn_scr[:, h * dh:(h + 1) * dh] = (
            o[h * Bt:(h + 1) * Bt].reshape(M, dh).astype(jnp.bfloat16))
    attn = jnp.dot(attn_scr[...], wo_ref[...],
                   preferred_element_type=jnp.float32) + bo_ref[...]     # (M, D)

    # ---- residual + LayerNorm 1 ----
    h1 = _layernorm(x2 + attn, g1_ref[...], be1_ref[...])

    # ---- feed-forward: Linear -> ReLU -> Linear ----
    ff = jnp.dot(h1.astype(jnp.bfloat16), w1_ref[...],
                 preferred_element_type=jnp.float32) + b1_ref[...]
    ff = jnp.maximum(ff, 0.0)
    ff = jnp.dot(ff.astype(jnp.bfloat16), w2_ref[...],
                 preferred_element_type=jnp.float32) + b2_ref[...]

    # ---- residual + LayerNorm 2 ----
    out = _layernorm(h1 + ff, g2_ref[...], be2_ref[...])
    acc_ref[...] = out.reshape(Bt, S, D)

    # ---- last layer: optional final norm fused in, then single HBM write ----
    @pl.when(layer == num_layers - 1)
    def _():
        final = acc_ref[...]
        if use_final_norm:
            final = _layernorm(final, gn_ref[...], bn_ref[...])
        o_ref[...] = final.astype(o_ref.dtype)


def init_params(key, d_model, nhead, dim_ff):
    """Deterministic synthetic parameters for ONE shared encoder layer."""
    ks = jax.random.split(key, 6)
    s = 1.0 / math.sqrt(d_model)
    return {
        "wq": jax.random.normal(ks[0], (d_model, d_model), jnp.float32) * s,
        "bq": jnp.zeros((1, d_model), jnp.float32),
        "wk": jax.random.normal(ks[1], (d_model, d_model), jnp.float32) * s,
        "bk": jnp.zeros((1, d_model), jnp.float32),
        "wv": jax.random.normal(ks[2], (d_model, d_model), jnp.float32) * s,
        "bv": jnp.zeros((1, d_model), jnp.float32),
        "wo": jax.random.normal(ks[3], (d_model, d_model), jnp.float32) * s,
        "bo": jnp.zeros((1, d_model), jnp.float32),
        "w1": jax.random.normal(ks[4], (d_model, dim_ff), jnp.float32) * s,
        "b1": jnp.zeros((1, dim_ff), jnp.float32),
        "w2": jax.random.normal(ks[5], (dim_ff, d_model), jnp.float32)
              * (1.0 / math.sqrt(dim_ff)),
        "b2": jnp.zeros((1, d_model), jnp.float32),
        "g1": jnp.ones((1, d_model), jnp.float32),
        "be1": jnp.zeros((1, d_model), jnp.float32),
        "g2": jnp.ones((1, d_model), jnp.float32),
        "be2": jnp.zeros((1, d_model), jnp.float32),
        # final norm (self.norm) parameters
        "gn": jnp.ones((1, d_model), jnp.float32),
        "bn": jnp.zeros((1, d_model), jnp.float32),
    }


def _pick_batch_block(B, S, target_rows=512):
    """Pick Bt | B: prefer nb = B//Bt >= 2 (so the 'parallel' batch axis can
    shard across both TensorCores on megacore parts) and Bt*S >= target_rows
    to amortize per-grid-step overhead and fill the MXU."""
    divs = [d for d in range(1, B + 1) if B % d == 0]
    cand = [d for d in divs if B // d >= 2] or divs
    for d in cand:
        if d * S >= target_rows:
            return d
    return cand[-1]


def _padded_bytes(shape, itemsize):
    """Rough VMEM footprint: lane dim padded to 128, sublane to the dtype tile."""
    shape = tuple(shape)
    lane = -(-shape[-1] // 128) * 128
    if len(shape) == 1:
        return lane * itemsize
    sub_tile = 8 * (4 // min(itemsize, 4))       # f32: 8 rows, bf16: 16 rows
    sub = -(-shape[-2] // sub_tile) * sub_tile
    lead = 1
    for d in shape[:-2]:
        lead *= d
    return lead * sub * lane * itemsize


def _estimate_vmem(Bt, S, D, F, nhead, out_itemsize, has_mask, single_buffered):
    """Resident VMEM estimate (weights + pipeline buffers + scratch + temps)."""
    M, G, dh = Bt * S, nhead * Bt, D // nhead
    wmul = 1 if single_buffered else 2
    b = 0
    # weights (bf16) + biases / norm params (f32)
    b += wmul * (_padded_bytes((D, 3 * D), 2) + _padded_bytes((D, D), 2)
                 + _padded_bytes((D, F), 2) + _padded_bytes((F, D), 2))
    b += wmul * (_padded_bytes((1, 3 * D), 4) + 7 * _padded_bytes((1, D), 4)
                 + _padded_bytes((1, F), 4))
    if has_mask:
        b += wmul * _padded_bytes((S, S), 4)
    # activation pipeline buffers
    b += wmul * _padded_bytes((Bt, S, D), 4)             # x blocks
    b += 2 * _padded_bytes((Bt, S, D), out_itemsize)     # out blocks
    # scratch
    b += _padded_bytes((Bt, S, D), 4)                    # f32 accumulator
    b += 3 * _padded_bytes((G, S, dh), 2)                # q/k/v head-major
    b += _padded_bytes((M, D), 2)                        # assembled attn out
    # transient values (qkv, scores/probs, ffn hidden, a few (M, D) temps)
    b += _padded_bytes((M, 3 * D), 4) + 2 * _padded_bytes((G, S, S), 4)
    b += _padded_bytes((M, F), 4) + 4 * _padded_bytes((M, D), 4)
    return b


def transformer_encoder(src, params, *, num_layers, nhead, mask=None,
                        use_final_norm=True, block_b=None):
    """Equivalent of TransformerEncoder.forward(src, mask) — single kernel."""
    B, S, D = src.shape
    F = params["w1"].shape[1]
    assert D % nhead == 0
    # NOTE: S % 8 == 0 makes the in-kernel (Bt,S,D) <-> (M,D) views free
    # (sublane tile); other S still works but pays a relayout copy per layer.

    has_mask = mask is not None
    if has_mask:
        if mask.dtype == jnp.bool_:
            # PyTorch bool src_mask: True == masked.  Large-negative (not -inf)
            # keeps fully-masked rows finite.
            mask_arr = jnp.where(mask, jnp.float32(-1e9), jnp.float32(0.0))
        else:
            mask_arr = mask.astype(jnp.float32)

    Bt = block_b if block_b is not None else _pick_batch_block(B, S)
    assert B % Bt == 0
    nb = B // Bt
    M, dh, G = Bt * S, D // nhead, nhead * Bt

    # Fuse Q/K/V into one (D, 3D) weight at wrapper level; cast matmul weights
    # to bf16 (native MXU dtype, halves weight VMEM footprint and DMA bytes).
    w_qkv = jnp.concatenate(
        [params["wq"], params["wk"], params["wv"]], axis=1).astype(jnp.bfloat16)
    b_qkv = jnp.concatenate(
        [params["bq"], params["bk"], params["bv"]], axis=1).astype(jnp.float32)
    wo = params["wo"].astype(jnp.bfloat16)
    w1 = params["w1"].astype(jnp.bfloat16)
    w2 = params["w2"].astype(jnp.bfloat16)

    kernel = functools.partial(_encoder_stack_kernel, nhead=nhead,
                               use_final_norm=use_final_norm, has_mask=has_mask)

    def _build_and_run(single_buffered):
        mode = {"pipeline_mode": pl.Buffered(1)} if single_buffered else {}

        def const_spec(shape):
            nd = len(shape)
            return pl.BlockSpec(shape, lambda b, l, _nd=nd: (0,) * _nd, **mode)

        x_spec = pl.BlockSpec((Bt, S, D), lambda b, l: (b, 0, 0), **mode)
        in_specs = [x_spec]
        args = [src]
        if has_mask:
            in_specs.append(const_spec((S, S)))
            args.append(mask_arr)
        in_specs += [const_spec((D, 3 * D)), const_spec((1, 3 * D)),   # qkv
                     const_spec((D, D)), const_spec((1, D)),           # out proj
                     const_spec((D, F)), const_spec((1, F)),           # ffn 1
                     const_spec((F, D)), const_spec((1, D)),           # ffn 2
                     const_spec((1, D)), const_spec((1, D)),           # ln1
                     const_spec((1, D)), const_spec((1, D)),           # ln2
                     const_spec((1, D)), const_spec((1, D))]           # final ln
        args += [w_qkv, b_qkv, wo, params["bo"], w1, params["b1"],
                 w2, params["b2"], params["g1"], params["be1"],
                 params["g2"], params["be2"], params["gn"], params["bn"]]

        est = _estimate_vmem(Bt, S, D, F, nhead, src.dtype.itemsize,
                             has_mask, single_buffered)
        vmem_limit = max(32 << 20, min(int(1.3 * est), 100 << 20))

        return pl.pallas_call(
            kernel,
            out_shape=jax.ShapeDtypeStruct((B, S, D), src.dtype),
            grid=(nb, num_layers),
            in_specs=in_specs,
            out_specs=pl.BlockSpec((Bt, S, D), lambda b, l: (b, 0, 0)),
            scratch_shapes=[pltpu.VMEM((Bt, S, D), jnp.float32),    # resident acts
                            pltpu.VMEM((G, S, dh), jnp.bfloat16),   # q (head-major)
                            pltpu.VMEM((G, S, dh), jnp.bfloat16),   # k
                            pltpu.VMEM((G, S, dh), jnp.bfloat16),   # v
                            pltpu.VMEM((M, D), jnp.bfloat16)],      # attn assembly
            # src and out have identical shape/dtype and out is only written at
            # the last layer -> reuse the buffer (saves an HBM alloc + VMEM).
            input_output_aliases={0: 0},
            compiler_params=pltpu.CompilerParams(
                dimension_semantics=("parallel", "arbitrary"),
                vmem_limit_bytes=vmem_limit),
        )(*args)

    try:
        # Single-buffer the weight / bias / x operands (their index_maps never
        # change along the layer axis): halves the resident weight VMEM.
        return _build_and_run(True)
    except Exception:
        # pl.Buffered(1) unavailable in this jax/Mosaic build -> fall back to
        # the default double-buffered pipeline (correct, just more VMEM).
        return _build_and_run(False)


if __name__ == "__main__":
    B, S, D = 2, 8, 32       # batch, seq, d_model  (S % 8 == 0)
    NHEAD, FF = 4, 64        # heads, feed-forward width
    NUM_LAYERS = 2

    key = jax.random.PRNGKey(0)
    k_x, k_p = jax.random.split(key)
    src = jax.random.normal(k_x, (B, S, D), jnp.float32)
    params = init_params(k_p, D, NHEAD, FF)

    out = transformer_encoder(src, params, num_layers=NUM_LAYERS,
                              nhead=NHEAD, mask=None, use_final_norm=True)
    out = jax.block_until_ready(out)
    assert out.shape == (B, S, D) and bool(jnp.all(jnp.isfinite(out)))
    print("KERNEL_OK")
</pallas_src>

<mosaic_0001>
module attributes {stable_mosaic.version = 11 : i64} {
  func.func @_encoder_stack_kernel(%arg0: i32, %arg1: i32, %arg2: memref<1x8x32xf32, #tpu.memory_space<vmem>>, %arg3: memref<32x96xbf16, #tpu.memory_space<vmem>>, %arg4: memref<1x96xf32, #tpu.memory_space<vmem>>, %arg5: memref<32x32xbf16, #tpu.memory_space<vmem>>, %arg6: memref<1x32xf32, #tpu.memory_space<vmem>>, %arg7: memref<32x64xbf16, #tpu.memory_space<vmem>>, %arg8: memref<1x64xf32, #tpu.memory_space<vmem>>, %arg9: memref<64x32xbf16, #tpu.memory_space<vmem>>, %arg10: memref<1x32xf32, #tpu.memory_space<vmem>>, %arg11: memref<1x32xf32, #tpu.memory_space<vmem>>, %arg12: memref<1x32xf32, #tpu.memory_space<vmem>>, %arg13: memref<1x32xf32, #tpu.memory_space<vmem>>, %arg14: memref<1x32xf32, #tpu.memory_space<vmem>>, %arg15: memref<1x32xf32, #tpu.memory_space<vmem>>, %arg16: memref<1x32xf32, #tpu.memory_space<vmem>>, %arg17: memref<1x8x32xf32, #tpu.memory_space<vmem>>, %arg18: memref<1x8x32xf32, #tpu.memory_space<vmem>>, %arg19: memref<4x8x8xbf16, #tpu.memory_space<vmem>>, %arg20: memref<4x8x8xbf16, #tpu.memory_space<vmem>>, %arg21: memref<4x8x8xbf16, #tpu.memory_space<vmem>>, %arg22: memref<8x32xbf16, #tpu.memory_space<vmem>>) attributes {dimension_semantics = [#tpu.dimension_semantics<parallel>, #tpu.dimension_semantics<arbitrary>], iteration_bounds = array<i64: 2, 2>, scalar_prefetch = 0 : i64, scratch_operands = 5 : i64, tpu.core_type = #tpu.core_type<tc>, window_params = [{pipeline_mode = #tpu.pipeline_mode<synchronous>, transform_indices = @transform_0, window_bounds = array<i64: 1, 8, 32>}, {pipeline_mode = #tpu.pipeline_mode<synchronous>, transform_indices = @transform_1, window_bounds = array<i64: 32, 96>}, {pipeline_mode = #tpu.pipeline_mode<synchronous>, transform_indices = @transform_2, window_bounds = array<i64: 1, 96>}, {pipeline_mode = #tpu.pipeline_mode<synchronous>, transform_indices = @transform_3, window_bounds = array<i64: 32, 32>}, {pipeline_mode = #tpu.pipeline_mode<synchronous>, transform_indices = @transform_4, window_bounds = array<i64: 1, 32>}, {pipeline_mode = #tpu.pipeline_mode<synchronous>, transform_indices = @transform_5, window_bounds = array<i64: 32, 64>}, {pipeline_mode = #tpu.pipeline_mode<synchronous>, transform_indices = @transform_6, window_bounds = array<i64: 1, 64>}, {pipeline_mode = #tpu.pipeline_mode<synchronous>, transform_indices = @transform_7, window_bounds = array<i64: 64, 32>}, {pipeline_mode = #tpu.pipeline_mode<synchronous>, transform_indices = @transform_8, window_bounds = array<i64: 1, 32>}, {pipeline_mode = #tpu.pipeline_mode<synchronous>, transform_indices = @transform_9, window_bounds = array<i64: 1, 32>}, {pipeline_mode = #tpu.pipeline_mode<synchronous>, transform_indices = @transform_10, window_bounds = array<i64: 1, 32>}, {pipeline_mode = #tpu.pipeline_mode<synchronous>, transform_indices = @transform_11, window_bounds = array<i64: 1, 32>}, {pipeline_mode = #tpu.pipeline_mode<synchronous>, transform_indices = @transform_12, window_bounds = array<i64: 1, 32>}, {pipeline_mode = #tpu.pipeline_mode<synchronous>, transform_indices = @transform_13, window_bounds = array<i64: 1, 32>}, {pipeline_mode = #tpu.pipeline_mode<synchronous>, transform_indices = @transform_14, window_bounds = array<i64: 1, 32>}, {transform_indices = @transform_15, window_bounds = array<i64: 1, 8, 32>}]} {
    %c0_i32 = arith.constant 0 : i32
    %0 = arith.cmpi eq, %arg1, %c0_i32 : i32
    %1 = arith.extui %0 : i1 to i32
    %c0_i32_0 = arith.constant 0 : i32
    %2 = arith.cmpi ne, %1, %c0_i32_0 : i32
    scf.if %2 {
      %c0_102 = arith.constant 0 : index
      %c0_103 = arith.constant 0 : index
      %c0_104 = arith.constant 0 : index
      %174 = vector.load %arg2[%c0_102, %c0_103, %c0_104] : memref<1x8x32xf32, #tpu.memory_space<vmem>>, vector<1x8x32xf32>
      %c0_105 = arith.constant 0 : index
      %c0_106 = arith.constant 0 : index
      %c0_107 = arith.constant 0 : index
      %175 = vector.load %arg18[%c0_105, %c0_106, %c0_107] : memref<1x8x32xf32, #tpu.memory_space<vmem>>, vector<1x8x32xf32>
      tpu.vector_store %arg18[%c0_105, %c0_106, %c0_107], %174 {strides = array<i32>} : memref<1x8x32xf32, #tpu.memory_space<vmem>>, vector<1x8x32xf32>,
    } else {
    }
    %c0 = arith.constant 0 : index
    %c0_1 = arith.constant 0 : index
    %c0_2 = arith.constant 0 : index
    %3 = vector.load %arg18[%c0, %c0_1, %c0_2] : memref<1x8x32xf32, #tpu.memory_space<vmem>>, vector<1x8x32xf32>
    %4 = vector.shape_cast %3 : vector<1x8x32xf32> to vector<8x32xf32>
    %5 = arith.truncf %4 : vector<8x32xf32> to vector<8x32xbf16>
    %c0_3 = arith.constant 0 : index
    %c0_4 = arith.constant 0 : index
    %6 = vector.load %arg3[%c0_3, %c0_4] : memref<32x96xbf16, #tpu.memory_space<vmem>>, vector<32x96xbf16>
    %cst = arith.constant dense<0.000000e+00> : vector<8x96xf32>
    %7 = tpu.matmul %5, %6, %cst {dimension_numbers = #tpu.dot_dimension_numbers<[1], [0], [0], [1], [0, 0, 1, 1], [], []>} : vector<8x32xbf16>, vector<32x96xbf16>, vector<8x96xf32> -> vector<8x96xf32>
    %c0_5 = arith.constant 0 : index
    %c0_6 = arith.constant 0 : index
    %8 = vector.load %arg4[%c0_5, %c0_6] : memref<1x96xf32, #tpu.memory_space<vmem>>, vector<1x96xf32>
    %9 = vector.broadcast %8 : vector<1x96xf32> to vector<8x96xf32>
    %10 = arith.addf %7, %9 : vector<8x96xf32>
    %11 = vector.extract_strided_slice %10 {offsets = [0, 0], sizes = [8, 8], strides = [1, 1]} : vector<8x96xf32> to vector<8x8xf32>
    %cst_7 = arith.constant 0.353553385 : f32
    %12 = vector.broadcast %cst_7 : f32 to vector<8x8xf32>
    %13 = arith.mulf %11, %12 : vector<8x8xf32>
    %14 = vector.shape_cast %13 : vector<8x8xf32> to vector<1x8x8xf32>
    %15 = arith.truncf %14 : vector<1x8x8xf32> to vector<1x8x8xbf16>
    %c0_8 = arith.constant 0 : index
    %c0_9 = arith.constant 0 : index
    %c0_10 = arith.constant 0 : index
    %16 = vector.load %arg19[%c0_8, %c0_9, %c0_10] : memref<4x8x8xbf16, #tpu.memory_space<vmem>>, vector<1x8x8xbf16>
    tpu.vector_store %arg19[%c0_8, %c0_9, %c0_10], %15 {strides = array<i32>} : memref<4x8x8xbf16, #tpu.memory_space<vmem>>, vector<1x8x8xbf16>,
    %17 = vector.extract_strided_slice %10 {offsets = [0, 32], sizes = [8, 8], strides = [1, 1]} : vector<8x96xf32> to vector<8x8xf32>
    %18 = vector.shape_cast %17 : vector<8x8xf32> to vector<1x8x8xf32>
    %19 = arith.truncf %18 : vector<1x8x8xf32> to vector<1x8x8xbf16>
    %c0_11 = arith.constant 0 : index
    %c0_12 = arith.constant 0 : index
    %c0_13 = arith.constant 0 : index
    %20 = vector.load %arg20[%c0_11, %c0_12, %c0_13] : memref<4x8x8xbf16, #tpu.memory_space<vmem>>, vector<1x8x8xbf16>
    tpu.vector_store %arg20[%c0_11, %c0_12, %c0_13], %19 {strides = array<i32>} : memref<4x8x8xbf16, #tpu.memory_space<vmem>>, vector<1x8x8xbf16>,
    %21 = vector.extract_strided_slice %10 {offsets = [0, 64], sizes = [8, 8], strides = [1, 1]} : vector<8x96xf32> to vector<8x8xf32>
    %22 = vector.shape_cast %21 : vector<8x8xf32> to vector<1x8x8xf32>
    %23 = arith.truncf %22 : vector<1x8x8xf32> to vector<1x8x8xbf16>
    %c0_14 = arith.constant 0 : index
    %c0_15 = arith.constant 0 : index
    %c0_16 = arith.constant 0 : index
    %24 = vector.load %arg21[%c0_14, %c0_15, %c0_16] : memref<4x8x8xbf16, #tpu.memory_space<vmem>>, vector<1x8x8xbf16>
    tpu.vector_store %arg21[%c0_14, %c0_15, %c0_16], %23 {strides = array<i32>} : memref<4x8x8xbf16, #tpu.memory_space<vmem>>, vector<1x8x8xbf16>,
    %25 = vector.extract_strided_slice %10 {offsets = [0, 8], sizes = [8, 8], strides = [1, 1]} : vector<8x96xf32> to vector<8x8xf32>
    %cst_17 = arith.constant 0.353553385 : f32
    %26 = vector.broadcast %cst_17 : f32 to vector<8x8xf32>
    %27 = arith.mulf %25, %26 : vector<8x8xf32>
    %28 = vector.shape_cast %27 : vector<8x8xf32> to vector<1x8x8xf32>
    %29 = arith.truncf %28 : vector<1x8x8xf32> to vector<1x8x8xbf16>
    %c1 = arith.constant 1 : index
    %c0_18 = arith.constant 0 : index
    %c0_19 = arith.constant 0 : index
    %30 = vector.load %arg19[%c1, %c0_18, %c0_19] : memref<4x8x8xbf16, #tpu.memory_space<vmem>>, vector<1x8x8xbf16>
    tpu.vector_store %arg19[%c1, %c0_18, %c0_19], %29 {strides = array<i32>} : memref<4x8x8xbf16, #tpu.memory_space<vmem>>, vector<1x8x8xbf16>,
    %31 = vector.extract_strided_slice %10 {offsets = [0, 40], sizes = [8, 8], strides = [1, 1]} : vector<8x96xf32> to vector<8x8xf32>
    %32 = vector.shape_cast %31 : vector<8x8xf32> to vector<1x8x8xf32>
    %33 = arith.truncf %32 : vector<1x8x8xf32> to vector<1x8x8xbf16>
    %c1_20 = arith.constant 1 : index
    %c0_21 = arith.constant 0 : index
    %c0_22 = arith.constant 0 : index
    %34 = vector.load %arg20[%c1_20, %c0_21, %c0_22] : memref<4x8x8xbf16, #tpu.memory_space<vmem>>, vector<1x8x8xbf16>
    tpu.vector_store %arg20[%c1_20, %c0_21, %c0_22], %33 {strides = array<i32>} : memref<4x8x8xbf16, #tpu.memory_space<vmem>>, vector<1x8x8xbf16>,
    %35 = vector.extract_strided_slice %10 {offsets = [0, 72], sizes = [8, 8], strides = [1, 1]} : vector<8x96xf32> to vector<8x8xf32>
    %36 = vector.shape_cast %35 : vector<8x8xf32> to vector<1x8x8xf32>
    %37 = arith.truncf %36 : vector<1x8x8xf32> to vector<1x8x8xbf16>
    %c1_23 = arith.constant 1 : index
    %c0_24 = arith.constant 0 : index
    %c0_25 = arith.constant 0 : index
    %38 = vector.load %arg21[%c1_23, %c0_24, %c0_25] : memref<4x8x8xbf16, #tpu.memory_space<vmem>>, vector<1x8x8xbf16>
    tpu.vector_store %arg21[%c1_23, %c0_24, %c0_25], %37 {strides = array<i32>} : memref<4x8x8xbf16, #tpu.memory_space<vmem>>, vector<1x8x8xbf16>,
    %39 = vector.extract_strided_slice %10 {offsets = [0, 16], sizes = [8, 8], strides = [1, 1]} : vector<8x96xf32> to vector<8x8xf32>
    %cst_26 = arith.constant 0.353553385 : f32
    %40 = vector.broadcast %cst_26 : f32 to vector<8x8xf32>
    %41 = arith.mulf %39, %40 : vector<8x8xf32>
    %42 = vector.shape_cast %41 : vector<8x8xf32> to vector<1x8x8xf32>
    %43 = arith.truncf %42 : vector<1x8x8xf32> to vector<1x8x8xbf16>
    %c2 = arith.constant 2 : index
    %c0_27 = arith.constant 0 : index
    %c0_28 = arith.constant 0 : index
    %44 = vector.load %arg19[%c2, %c0_27, %c0_28] : memref<4x8x8xbf16, #tpu.memory_space<vmem>>, vector<1x8x8xbf16>
    tpu.vector_store %arg19[%c2, %c0_27, %c0_28], %43 {strides = array<i32>} : memref<4x8x8xbf16, #tpu.memory_space<vmem>>, vector<1x8x8xbf16>,
    %45 = vector.extract_strided_slice %10 {offsets = [0, 48], sizes = [8, 8], strides = [1, 1]} : vector<8x96xf32> to vector<8x8xf32>
    %46 = vector.shape_cast %45 : vector<8x8xf32> to vector<1x8x8xf32>
    %47 = arith.truncf %46 : vector<1x8x8xf32> to vector<1x8x8xbf16>
    %c2_29 = arith.constant 2 : index
    %c0_30 = arith.constant 0 : index
    %c0_31 = arith.constant 0 : index
    %48 = vector.load %arg20[%c2_29, %c0_30, %c0_31] : memref<4x8x8xbf16, #tpu.memory_space<vmem>>, vector<1x8x8xbf16>
    tpu.vector_store %arg20[%c2_29, %c0_30, %c0_31], %47 {strides = array<i32>} : memref<4x8x8xbf16, #tpu.memory_space<vmem>>, vector<1x8x8xbf16>,
    %49 = vector.extract_strided_slice %10 {offsets = [0, 80], sizes = [8, 8], strides = [1, 1]} : vector<8x96xf32> to vector<8x8xf32>
    %50 = vector.shape_cast %49 : vector<8x8xf32> to vector<1x8x8xf32>
    %51 = arith.truncf %50 : vector<1x8x8xf32> to vector<1x8x8xbf16>
    %c2_32 = arith.constant 2 : index
    %c0_33 = arith.constant 0 : index
    %c0_34 = arith.constant 0 : index
    %52 = vector.load %arg21[%c2_32, %c0_33, %c0_34] : memref<4x8x8xbf16, #tpu.memory_space<vmem>>, vector<1x8x8xbf16>
    tpu.vector_store %arg21[%c2_32, %c0_33, %c0_34], %51 {strides = array<i32>} : memref<4x8x8xbf16, #tpu.memory_space<vmem>>, vector<1x8x8xbf16>,
    %53 = vector.extract_strided_slice %10 {offsets = [0, 24], sizes = [8, 8], strides = [1, 1]} : vector<8x96xf32> to vector<8x8xf32>
    %cst_35 = arith.constant 0.353553385 : f32
    %54 = vector.broadcast %cst_35 : f32 to vector<8x8xf32>
    %55 = arith.mulf %53, %54 : vector<8x8xf32>
    %56 = vector.shape_cast %55 : vector<8x8xf32> to vector<1x8x8xf32>
    %57 = arith.truncf %56 : vector<1x8x8xf32> to vector<1x8x8xbf16>
    %c3 = arith.constant 3 : index
    %c0_36 = arith.constant 0 : index
    %c0_37 = arith.constant 0 : index
    %58 = vector.load %arg19[%c3, %c0_36, %c0_37] : memref<4x8x8xbf16, #tpu.memory_space<vmem>>, vector<1x8x8xbf16>
    tpu.vector_store %arg19[%c3, %c0_36, %c0_37], %57 {strides = array<i32>} : memref<4x8x8xbf16, #tpu.memory_space<vmem>>, vector<1x8x8xbf16>,
    %59 = vector.extract_strided_slice %10 {offsets = [0, 56], sizes = [8, 8], strides = [1, 1]} : vector<8x96xf32> to vector<8x8xf32>
    %60 = vector.shape_cast %59 : vector<8x8xf32> to vector<1x8x8xf32>
    %61 = arith.truncf %60 : vector<1x8x8xf32> to vector<1x8x8xbf16>
    %c3_38 = arith.constant 3 : index
    %c0_39 = arith.constant 0 : index
    %c0_40 = arith.constant 0 : index
    %62 = vector.load %arg20[%c3_38, %c0_39, %c0_40] : memref<4x8x8xbf16, #tpu.memory_space<vmem>>, vector<1x8x8xbf16>
    tpu.vector_store %arg20[%c3_38, %c0_39, %c0_40], %61 {strides = array<i32>} : memref<4x8x8xbf16, #tpu.memory_space<vmem>>, vector<1x8x8xbf16>,
    %63 = vector.extract_strided_slice %10 {offsets = [0, 88], sizes = [8, 8], strides = [1, 1]} : vector<8x96xf32> to vector<8x8xf32>
    %64 = vector.shape_cast %63 : vector<8x8xf32> to vector<1x8x8xf32>
    %65 = arith.truncf %64 : vector<1x8x8xf32> to vector<1x8x8xbf16>
    %c3_41 = arith.constant 3 : index
    %c0_42 = arith.constant 0 : index
    %c0_43 = arith.constant 0 : index
    %66 = vector.load %arg21[%c3_41, %c0_42, %c0_43] : memref<4x8x8xbf16, #tpu.memory_space<vmem>>, vector<1x8x8xbf16>
    tpu.vector_store %arg21[%c3_41, %c0_42, %c0_43], %65 {strides = array<i32>} : memref<4x8x8xbf16, #tpu.memory_space<vmem>>, vector<1x8x8xbf16>,
    %c0_44 = arith.constant 0 : index
    %c0_45 = arith.constant 0 : index
    %c0_46 = arith.constant 0 : index
    %67 = vector.load %arg19[%c0_44, %c0_45, %c0_46] : memref<4x8x8xbf16, #tpu.memory_space<vmem>>, vector<4x8x8xbf16>
    %c0_47 = arith.constant 0 : index
    %c0_48 = arith.constant 0 : index
    %c0_49 = arith.constant 0 : index
    %68 = vector.load %arg20[%c0_47, %c0_48, %c0_49] : memref<4x8x8xbf16, #tpu.memory_space<vmem>>, vector<4x8x8xbf16>
    %c0_50 = arith.constant 0 : index
    %c0_51 = arith.constant 0 : index
    %c0_52 = arith.constant 0 : index
    %69 = vector.load %arg21[%c0_50, %c0_51, %c0_52] : memref<4x8x8xbf16, #tpu.memory_space<vmem>>, vector<4x8x8xbf16>
    %cst_53 = arith.constant dense<0.000000e+00> : vector<4x8x8xf32>
    %70 = tpu.matmul %67, %68, %cst_53 {dimension_numbers = #tpu.dot_dimension_numbers<[2], [2], [1], [1], [0, 0, 0, 1, 1, 1], [0], [0]>} : vector<4x8x8xbf16>, vector<4x8x8xbf16>, vector<4x8x8xf32> -> vector<4x8x8xf32>
    %cst_54 = arith.constant dense<0xFF800000> : vector<4x8xf32>
    %71 = vector.multi_reduction <maximumf>, %70, %cst_54 [2] : vector<4x8x8xf32> to vector<4x8xf32>
    %72 = vector.shape_cast %71 : vector<4x8xf32> to vector<4x8x1xf32>
    %73 = vector.broadcast %72 : vector<4x8x1xf32> to vector<4x8x8xf32>
    %74 = arith.subf %70, %73 : vector<4x8x8xf32>
    %75 = math.exp %74 : vector<4x8x8xf32>
    %cst_55 = arith.constant dense<0.000000e+00> : vector<4x8xf32>
    %76 = vector.multi_reduction <add>, %75, %cst_55 [2] : vector<4x8x8xf32> to vector<4x8xf32>
    %77 = vector.shape_cast %76 : vector<4x8xf32> to vector<4x8x1xf32>
    %78 = tpu.reciprocal %77 {approx = true} : vector<4x8x1xf32> -> vector<4x8x1xf32>
    %79 = vector.broadcast %78 : vector<4x8x1xf32> to vector<4x8x8xf32>
    %80 = arith.mulf %75, %79 : vector<4x8x8xf32>
    %81 = arith.truncf %80 : vector<4x8x8xf32> to vector<4x8x8xbf16>
    %cst_56 = arith.constant dense<0.000000e+00> : vector<4x8x8xf32>
    %82 = tpu.matmul %81, %69, %cst_56 {dimension_numbers = #tpu.dot_dimension_numbers<[2], [1], [1], [2], [0, 0, 0, 1, 1, 2], [0], [0]>} : vector<4x8x8xbf16>, vector<4x8x8xbf16>, vector<4x8x8xf32> -> vector<4x8x8xf32>
    %83 = vector.extract_strided_slice %82 {offsets = [0, 0, 0], sizes = [1, 8, 8], strides = [1, 1, 1]} : vector<4x8x8xf32> to vector<1x8x8xf32>
    %84 = vector.shape_cast %83 : vector<1x8x8xf32> to vector<8x8xf32>
    %85 = arith.truncf %84 : vector<8x8xf32> to vector<8x8xbf16>
    %c0_57 = arith.constant 0 : index
    %c0_58 = arith.constant 0 : index
    %86 = vector.load %arg22[%c0_57, %c0_58] : memref<8x32xbf16, #tpu.memory_space<vmem>>, vector<8x8xbf16>
    tpu.vector_store %arg22[%c0_57, %c0_58], %85 {strides = array<i32>} : memref<8x32xbf16, #tpu.memory_space<vmem>>, vector<8x8xbf16>,
    %87 = vector.extract_strided_slice %82 {offsets = [1, 0, 0], sizes = [1, 8, 8], strides = [1, 1, 1]} : vector<4x8x8xf32> to vector<1x8x8xf32>
    %88 = vector.shape_cast %87 : vector<1x8x8xf32> to vector<8x8xf32>
    %89 = arith.truncf %88 : vector<8x8xf32> to vector<8x8xbf16>
    %c0_59 = arith.constant 0 : index
    %c8 = arith.constant 8 : index
    %90 = vector.load %arg22[%c0_59, %c8] : memref<8x32xbf16, #tpu.memory_space<vmem>>, vector<8x8xbf16>
    tpu.vector_store %arg22[%c0_59, %c8], %89 {strides = array<i32>} : memref<8x32xbf16, #tpu.memory_space<vmem>>, vector<8x8xbf16>,
    %91 = vector.extract_strided_slice %82 {offsets = [2, 0, 0], sizes = [1, 8, 8], strides = [1, 1, 1]} : vector<4x8x8xf32> to vector<1x8x8xf32>
    %92 = vector.shape_cast %91 : vector<1x8x8xf32> to vector<8x8xf32>
    %93 = arith.truncf %92 : vector<8x8xf32> to vector<8x8xbf16>
    %c0_60 = arith.constant 0 : index
    %c16 = arith.constant 16 : index
    %94 = vector.load %arg22[%c0_60, %c16] : memref<8x32xbf16, #tpu.memory_space<vmem>>, vector<8x8xbf16>
    tpu.vector_store %arg22[%c0_60, %c16], %93 {strides = array<i32>} : memref<8x32xbf16, #tpu.memory_space<vmem>>, vector<8x8xbf16>,
    %95 = vector.extract_strided_slice %82 {offsets = [3, 0, 0], sizes = [1, 8, 8], strides = [1, 1, 1]} : vector<4x8x8xf32> to vector<1x8x8xf32>
    %96 = vector.shape_cast %95 : vector<1x8x8xf32> to vector<8x8xf32>
    %97 = arith.truncf %96 : vector<8x8xf32> to vector<8x8xbf16>
    %c0_61 = arith.constant 0 : index
    %c24 = arith.constant 24 : index
    %98 = vector.load %arg22[%c0_61, %c24] : memref<8x32xbf16, #tpu.memory_space<vmem>>, vector<8x8xbf16>
    tpu.vector_store %arg22[%c0_61, %c24], %97 {strides = array<i32>} : memref<8x32xbf16, #tpu.memory_space<vmem>>, vector<8x8xbf16>,
    %c0_62 = arith.constant 0 : index
    %c0_63 = arith.constant 0 : index
    %99 = vector.load %arg22[%c0_62, %c0_63] : memref<8x32xbf16, #tpu.memory_space<vmem>>, vector<8x32xbf16>
    %c0_64 = arith.constant 0 : index
    %c0_65 = arith.constant 0 : index
    %100 = vector.load %arg5[%c0_64, %c0_65] : memref<32x32xbf16, #tpu.memory_space<vmem>>, vector<32x32xbf16>
    %cst_66 = arith.constant dense<0.000000e+00> : vector<8x32xf32>
    %101 = tpu.matmul %99, %100, %cst_66 {dimension_numbers = #tpu.dot_dimension_numbers<[1], [0], [0], [1], [0, 0, 1, 1], [], []>} : vector<8x32xbf16>, vector<32x32xbf16>, vector<8x32xf32> -> vector<8x32xf32>
    %c0_67 = arith.constant 0 : index
    %c0_68 = arith.constant 0 : index
    %102 = vector.load %arg6[%c0_67, %c0_68] : memref<1x32xf32, #tpu.memory_space<vmem>>, vector<1x32xf32>
    %103 = vector.broadcast %102 : vector<1x32xf32> to vector<8x32xf32>
    %104 = arith.addf %101, %103 : vector<8x32xf32>
    %105 = arith.addf %4, %104 : vector<8x32xf32>
    %c0_69 = arith.constant 0 : index
    %c0_70 = arith.constant 0 : index
    %106 = vector.load %arg11[%c0_69, %c0_70] : memref<1x32xf32, #tpu.memory_space<vmem>>, vector<1x32xf32>
    %c0_71 = arith.constant 0 : index
    %c0_72 = arith.constant 0 : index
    %107 = vector.load %arg12[%c0_71, %c0_72] : memref<1x32xf32, #tpu.memory_space<vmem>>, vector<1x32xf32>
    %cst_73 = arith.constant dense<0.000000e+00> : vector<8xf32>
    %108 = vector.multi_reduction <add>, %105, %cst_73 [1] : vector<8x32xf32> to vector<8xf32>
    %109 = vector.shape_cast %108 : vector<8xf32> to vector<8x1xf32>
    %cst_74 = arith.constant 3.200000e+01 : f32
    %110 = vector.broadcast %cst_74 : f32 to vector<8x1xf32>
    %111 = arith.divf %109, %110 : vector<8x1xf32>
    %112 = vector.broadcast %111 : vector<8x1xf32> to vector<8x32xf32>
    %113 = arith.subf %105, %112 : vector<8x32xf32>
    %114 = arith.mulf %113, %113 : vector<8x32xf32>
    %cst_75 = arith.constant dense<0.000000e+00> : vector<8xf32>
    %115 = vector.multi_reduction <add>, %114, %cst_75 [1] : vector<8x32xf32> to vector<8xf32>
    %116 = vector.shape_cast %115 : vector<8xf32> to vector<8x1xf32>
    %cst_76 = arith.constant 3.200000e+01 : f32
    %117 = vector.broadcast %cst_76 : f32 to vector<8x1xf32>
    %118 = arith.divf %116, %117 : vector<8x1xf32>
    %119 = vector.broadcast %111 : vector<8x1xf32> to vector<8x32xf32>
    %120 = arith.subf %105, %119 : vector<8x32xf32>
    %cst_77 = arith.constant 9.99999974E-6 : f32
    %121 = vector.broadcast %cst_77 : f32 to vector<8x1xf32>
    %122 = arith.addf %118, %121 : vector<8x1xf32>
    %123 = math.rsqrt %122 : vector<8x1xf32>
    %124 = vector.broadcast %123 : vector<8x1xf32> to vector<8x32xf32>
    %125 = arith.mulf %120, %124 : vector<8x32xf32>
    %126 = vector.broadcast %106 : vector<1x32xf32> to vector<8x32xf32>
    %127 = arith.mulf %125, %126 : vector<8x32xf32>
    %128 = vector.broadcast %107 : vector<1x32xf32> to vector<8x32xf32>
    %129 = arith.addf %127, %128 : vector<8x32xf32>
    %130 = arith.truncf %129 : vector<8x32xf32> to vector<8x32xbf16>
    %c0_78 = arith.constant 0 : index
    %c0_79 = arith.constant 0 : index
    %131 = vector.load %arg7[%c0_78, %c0_79] : memref<32x64xbf16, #tpu.memory_space<vmem>>, vector<32x64xbf16>
    %cst_80 = arith.constant dense<0.000000e+00> : vector<8x64xf32>
    %132 = tpu.matmul %130, %131, %cst_80 {dimension_numbers = #tpu.dot_dimension_numbers<[1], [0], [0], [1], [0, 0, 1, 1], [], []>} : vector<8x32xbf16>, vector<32x64xbf16>, vector<8x64xf32> -> vector<8x64xf32>
    %c0_81 = arith.constant 0 : index
    %c0_82 = arith.constant 0 : index
    %133 = vector.load %arg8[%c0_81, %c0_82] : memref<1x64xf32, #tpu.memory_space<vmem>>, vector<1x64xf32>
    %134 = vector.broadcast %133 : vector<1x64xf32> to vector<8x64xf32>
    %135 = arith.addf %132, %134 : vector<8x64xf32>
    %cst_83 = arith.constant 0.000000e+00 : f32
    %136 = vector.broadcast %cst_83 : f32 to vector<8x64xf32>
    %137 = arith.maximumf %135, %136 : vector<8x64xf32>
    %138 = arith.truncf %137 : vector<8x64xf32> to vector<8x64xbf16>
    %c0_84 = arith.constant 0 : index
    %c0_85 = arith.constant 0 : index
    %139 = vector.load %arg9[%c0_84, %c0_85] : memref<64x32xbf16, #tpu.memory_space<vmem>>, vector<64x32xbf16>
    %cst_86 = arith.constant dense<0.000000e+00> : vector<8x32xf32>
    %140 = tpu.matmul %138, %139, %cst_86 {dimension_numbers = #tpu.dot_dimension_numbers<[1], [0], [0], [1], [0, 0, 1, 1], [], []>} : vector<8x64xbf16>, vector<64x32xbf16>, vector<8x32xf32> -> vector<8x32xf32>
    %c0_87 = arith.constant 0 : index
    %c0_88 = arith.constant 0 : index
    %141 = vector.load %arg10[%c0_87, %c0_88] : memref<1x32xf32, #tpu.memory_space<vmem>>, vector<1x32xf32>
    %142 = vector.broadcast %141 : vector<1x32xf32> to vector<8x32xf32>
    %143 = arith.addf %140, %142 : vector<8x32xf32>
    %144 = arith.addf %129, %143 : vector<8x32xf32>
    %c0_89 = arith.constant 0 : index
    %c0_90 = arith.constant 0 : index
    %145 = vector.load %arg13[%c0_89, %c0_90] : memref<1x32xf32, #tpu.memory_space<vmem>>, vector<1x32xf32>
    %c0_91 = arith.constant 0 : index
    %c0_92 = arith.constant 0 : index
    %146 = vector.load %arg14[%c0_91, %c0_92] : memref<1x32xf32, #tpu.memory_space<vmem>>, vector<1x32xf32>
    %cst_93 = arith.constant dense<0.000000e+00> : vector<8xf32>
    %147 = vector.multi_reduction <add>, %144, %cst_93 [1] : vector<8x32xf32> to vector<8xf32>
    %148 = vector.shape_cast %147 : vector<8xf32> to vector<8x1xf32>
    %cst_94 = arith.constant 3.200000e+01 : f32
    %149 = vector.broadcast %cst_94 : f32 to vector<8x1xf32>
    %150 = arith.divf %148, %149 : vector<8x1xf32>
    %151 = vector.broadcast %150 : vector<8x1xf32> to vector<8x32xf32>
    %152 = arith.subf %144, %151 : vector<8x32xf32>
    %153 = arith.mulf %152, %152 : vector<8x32xf32>
    %cst_95 = arith.constant dense<0.000000e+00> : vector<8xf32>
    %154 = vector.multi_reduction <add>, %153, %cst_95 [1] : vector<8x32xf32> to vector<8xf32>
    %155 = vector.shape_cast %154 : vector<8xf32> to vector<8x1xf32>
    %cst_96 = arith.constant 3.200000e+01 : f32
    %156 = vector.broadcast %cst_96 : f32 to vector<8x1xf32>
    %157 = arith.divf %155, %156 : vector<8x1xf32>
    %158 = vector.broadcast %150 : vector<8x1xf32> to vector<8x32xf32>
    %159 = arith.subf %144, %158 : vector<8x32xf32>
    %cst_97 = arith.constant 9.99999974E-6 : f32
    %160 = vector.broadcast %cst_97 : f32 to vector<8x1xf32>
    %161 = arith.addf %157, %160 : vector<8x1xf32>
    %162 = math.rsqrt %161 : vector<8x1xf32>
    %163 = vector.broadcast %162 : vector<8x1xf32> to vector<8x32xf32>
    %164 = arith.mulf %159, %163 : vector<8x32xf32>
    %165 = vector.broadcast %145 : vector<1x32xf32> to vector<8x32xf32>
    %166 = arith.mulf %164, %165 : vector<8x32xf32>
    %167 = vector.broadcast %146 : vector<1x32xf32> to vector<8x32xf32>
    %168 = arith.addf %166, %167 : vector<8x32xf32>
    %169 = vector.shape_cast %168 : vector<8x32xf32> to vector<1x8x32xf32>
    %c0_98 = arith.constant 0 : index
    %c0_99 = arith.constant 0 : index
    %c0_100 = arith.constant 0 : index
    %170 = vector.load %arg18[%c0_98, %c0_99, %c0_100] : memref<1x8x32xf32, #tpu.memory_space<vmem>>, vector<1x8x32xf32>
    tpu.vector_store %arg18[%c0_98, %c0_99, %c0_100], %169 {strides = array<i32>} : memref<1x8x32xf32, #tpu.memory_space<vmem>>, vector<1x8x32xf32>,
    %c1_i32 = arith.constant 1 : i32
    %171 = arith.cmpi eq, %arg1, %c1_i32 : i32
    %172 = arith.extui %171 : i1 to i32
    %c0_i32_101 = arith.constant 0 : i32
    %173 = arith.cmpi ne, %172, %c0_i32_101 : i32
    scf.if %173 {
      %c0_102 = arith.constant 0 : index
      %c0_103 = arith.constant 0 : index
      %c0_104 = arith.constant 0 : index
      %174 = vector.load %arg18[%c0_102, %c0_103, %c0_104] : memref<1x8x32xf32, #tpu.memory_space<vmem>>, vector<1x8x32xf32>
      %c0_105 = arith.constant 0 : index
      %c0_106 = arith.constant 0 : index
      %175 = vector.load %arg15[%c0_105, %c0_106] : memref<1x32xf32, #tpu.memory_space<vmem>>, vector<1x32xf32>
      %c0_107 = arith.constant 0 : index
      %c0_108 = arith.constant 0 : index
      %176 = vector.load %arg16[%c0_107, %c0_108] : memref<1x32xf32, #tpu.memory_space<vmem>>, vector<1x32xf32>
      %cst_109 = arith.constant dense<0.000000e+00> : vector<1x8xf32>
      %177 = vector.multi_reduction <add>, %174, %cst_109 [2] : vector<1x8x32xf32> to vector<1x8xf32>
      %178 = vector.shape_cast %177 : vector<1x8xf32> to vector<1x8x1xf32>
      %cst_110 = arith.constant 3.200000e+01 : f32
      %179 = vector.broadcast %cst_110 : f32 to vector<1x8x1xf32>
      %180 = arith.divf %178, %179 : vector<1x8x1xf32>
      %181 = vector.broadcast %180 : vector<1x8x1xf32> to vector<1x8x32xf32>
      %182 = arith.subf %174, %181 : vector<1x8x32xf32>
      %183 = arith.mulf %182, %182 : vector<1x8x32xf32>
      %cst_111 = arith.constant dense<0.000000e+00> : vector<1x8xf32>
      %184 = vector.multi_reduction <add>, %183, %cst_111 [2] : vector<1x8x32xf32> to vector<1x8xf32>
      %185 = vector.shape_cast %184 : vector<1x8xf32> to vector<1x8x1xf32>
      %cst_112 = arith.constant 3.200000e+01 : f32
      %186 = vector.broadcast %cst_112 : f32 to vector<1x8x1xf32>
      %187 = arith.divf %185, %186 : vector<1x8x1xf32>
      %188 = vector.broadcast %180 : vector<1x8x1xf32> to vector<1x8x32xf32>
      %189 = arith.subf %174, %188 : vector<1x8x32xf32>
      %cst_113 = arith.constant 9.99999974E-6 : f32
      %190 = vector.broadcast %cst_113 : f32 to vector<1x8x1xf32>
      %191 = arith.addf %187, %190 : vector<1x8x1xf32>
      %192 = math.rsqrt %191 : vector<1x8x1xf32>
      %193 = vector.broadcast %192 : vector<1x8x1xf32> to vector<1x8x32xf32>
      %194 = arith.mulf %189, %193 : vector<1x8x32xf32>
      %195 = vector.shape_cast %175 : vector<1x32xf32> to vector<1x1x32xf32>
      %196 = vector.broadcast %195 : vector<1x1x32xf32> to vector<1x8x32xf32>
      %197 = arith.mulf %194, %196 : vector<1x8x32xf32>
      %198 = vector.shape_cast %176 : vector<1x32xf32> to vector<1x1x32xf32>
      %199 = vector.broadcast %198 : vector<1x1x32xf32> to vector<1x8x32xf32>
      %200 = arith.addf %197, %199 : vector<1x8x32xf32>
      %c0_114 = arith.constant 0 : index
      %c0_115 = arith.constant 0 : index
      %c0_116 = arith.constant 0 : index
      %201 = vector.load %arg17[%c0_114, %c0_115, %c0_116] : memref<1x8x32xf32, #tpu.memory_space<vmem>>, vector<1x8x32xf32>
      tpu.vector_store %arg17[%c0_114, %c0_115, %c0_116], %200 {strides = array<i32>} : memref<1x8x32xf32, #tpu.memory_space<vmem>>, vector<1x8x32xf32>,
    } else {
    }
    return
  }
  func.func @transform_0(%arg0: i32, %arg1: i32) -> (i32, i32, i32) {
    %c0_i32 = arith.constant 0 : i32
    %c0_i32_0 = arith.constant 0 : i32
    %c0_i32_1 = arith.constant 0 : i32
    return %arg0, %c0_i32, %c0_i32_0 : i32, i32, i32
  }
  func.func @transform_1(%arg0: i32, %arg1: i32) -> (i32, i32) {
    %c0_i32 = arith.constant 0 : i32
    %c0_i32_0 = arith.constant 0 : i32
    %c0_i32_1 = arith.constant 0 : i32
    return %c0_i32, %c0_i32_0 : i32, i32
  }
  func.func @transform_2(%arg0: i32, %arg1: i32) -> (i32, i32) {
    %c0_i32 = arith.constant 0 : i32
    %c0_i32_0 = arith.constant 0 : i32
    %c0_i32_1 = arith.constant 0 : i32
    return %c0_i32, %c0_i32_0 : i32, i32
  }
  func.func @transform_3(%arg0: i32, %arg1: i32) -> (i32, i32) {
    %c0_i32 = arith.constant 0 : i32
    %c0_i32_0 = arith.constant 0 : i32
    %c0_i32_1 = arith.constant 0 : i32
    return %c0_i32, %c0_i32_0 : i32, i32
  }
  func.func @transform_4(%arg0: i32, %arg1: i32) -> (i32, i32) {
    %c0_i32 = arith.constant 0 : i32
    %c0_i32_0 = arith.constant 0 : i32
    %c0_i32_1 = arith.constant 0 : i32
    return %c0_i32, %c0_i32_0 : i32, i32
  }
  func.func @transform_5(%arg0: i32, %arg1: i32) -> (i32, i32) {
    %c0_i32 = arith.constant 0 : i32
    %c0_i32_0 = arith.constant 0 : i32
    %c0_i32_1 = arith.constant 0 : i32
    return %c0_i32, %c0_i32_0 : i32, i32
  }
  func.func @transform_6(%arg0: i32, %arg1: i32) -> (i32, i32) {
    %c0_i32 = arith.constant 0 : i32
    %c0_i32_0 = arith.constant 0 : i32
    %c0_i32_1 = arith.constant 0 : i32
    return %c0_i32, %c0_i32_0 : i32, i32
  }
  func.func @transform_7(%arg0: i32, %arg1: i32) -> (i32, i32) {
    %c0_i32 = arith.constant 0 : i32
    %c0_i32_0 = arith.constant 0 : i32
    %c0_i32_1 = arith.constant 0 : i32
    return %c0_i32, %c0_i32_0 : i32, i32
  }
  func.func @transform_8(%arg0: i32, %arg1: i32) -> (i32, i32) {
    %c0_i32 = arith.constant 0 : i32
    %c0_i32_0 = arith.constant 0 : i32
    %c0_i32_1 = arith.constant 0 : i32
    return %c0_i32, %c0_i32_0 : i32, i32
  }
  func.func @transform_9(%arg0: i32, %arg1: i32) -> (i32, i32) {
    %c0_i32 = arith.constant 0 : i32
    %c0_i32_0 = arith.constant 0 : i32
    %c0_i32_1 = arith.constant 0 : i32
    return %c0_i32, %c0_i32_0 : i32, i32
  }
  func.func @transform_10(%arg0: i32, %arg1: i32) -> (i32, i32) {
    %c0_i32 = arith.constant 0 : i32
    %c0_i32_0 = arith.constant 0 : i32
    %c0_i32_1 = arith.constant 0 : i32
    return %c0_i32, %c0_i32_0 : i32, i32
  }
  func.func @transform_11(%arg0: i32, %arg1: i32) -> (i32, i32) {
    %c0_i32 = arith.constant 0 : i32
    %c0_i32_0 = arith.constant 0 : i32
    %c0_i32_1 = arith.constant 0 : i32
    return %c0_i32, %c0_i32_0 : i32, i32
  }
  func.func @transform_12(%arg0: i32, %arg1: i32) -> (i32, i32) {
    %c0_i32 = arith.constant 0 : i32
    %c0_i32_0 = arith.constant 0 : i32
    %c0_i32_1 = arith.constant 0 : i32
    return %c0_i32, %c0_i32_0 : i32, i32
  }
  func.func @transform_13(%arg0: i32, %arg1: i32) -> (i32, i32) {
    %c0_i32 = arith.constant 0 : i32
    %c0_i32_0 = arith.constant 0 : i32
    %c0_i32_1 = arith.constant 0 : i32
    return %c0_i32, %c0_i32_0 : i32, i32
  }
  func.func @transform_14(%arg0: i32, %arg1: i32) -> (i32, i32) {
    %c0_i32 = arith.constant 0 : i32
    %c0_i32_0 = arith.constant 0 : i32
    %c0_i32_1 = arith.constant 0 : i32
    return %c0_i32, %c0_i32_0 : i32, i32
  }
  func.func @transform_15(%arg0: i32, %arg1: i32) -> (i32, i32, i32) {
    %c0_i32 = arith.constant 0 : i32
    %c0_i32_0 = arith.constant 0 : i32
    %c0_i32_1 = arith.constant 0 : i32
    return %arg0, %c0_i32, %c0_i32_0 : i32, i32, i32
  }
}

module attributes {stable_mosaic.version = 11 : i64} {
  func.func @_encoder_stack_kernel(%arg0: i32, %arg1: i32, %arg2: memref<1x8x32xf32, #tpu.memory_space<vmem>>, %arg3: memref<32x96xbf16, #tpu.memory_space<vmem>>, %arg4: memref<1x96xf32, #tpu.memory_space<vmem>>, %arg5: memref<32x32xbf16, #tpu.memory_space<vmem>>, %arg6: memref<1x32xf32, #tpu.memory_space<vmem>>, %arg7: memref<32x64xbf16, #tpu.memory_space<vmem>>, %arg8: memref<1x64xf32, #tpu.memory_space<vmem>>, %arg9: memref<64x32xbf16, #tpu.memory_space<vmem>>, %arg10: memref<1x32xf32, #tpu.memory_space<vmem>>, %arg11: memref<1x32xf32, #tpu.memory_space<vmem>>, %arg12: memref<1x32xf32, #tpu.memory_space<vmem>>, %arg13: memref<1x32xf32, #tpu.memory_space<vmem>>, %arg14: memref<1x32xf32, #tpu.memory_space<vmem>>, %arg15: memref<1x32xf32, #tpu.memory_space<vmem>>, %arg16: memref<1x32xf32, #tpu.memory_space<vmem>>, %arg17: memref<1x8x32xf32, #tpu.memory_space<vmem>>, %arg18: memref<1x8x32xf32, #tpu.memory_space<vmem>>, %arg19: memref<4x8x8xbf16, #tpu.memory_space<vmem>>, %arg20: memref<4x8x8xbf16, #tpu.memory_space<vmem>>, %arg21: memref<4x8x8xbf16, #tpu.memory_space<vmem>>, %arg22: memref<8x32xbf16, #tpu.memory_space<vmem>>) attributes {dimension_semantics = [#tpu.dimension_semantics<parallel>, #tpu.dimension_semantics<arbitrary>], iteration_bounds = array<i64: 2, 2>, scalar_prefetch = 0 : i64, scratch_operands = 5 : i64, tpu.core_type = #tpu.core_type<tc>, window_params = [{transform_indices = @transform_0, window_bounds = array<i64: 1, 8, 32>}, {pipeline_mode = #tpu.pipeline_mode<synchronous>, transform_indices = @transform_1, window_bounds = array<i64: 32, 96>}, {pipeline_mode = #tpu.pipeline_mode<synchronous>, transform_indices = @transform_2, window_bounds = array<i64: 1, 96>}, {pipeline_mode = #tpu.pipeline_mode<synchronous>, transform_indices = @transform_3, window_bounds = array<i64: 32, 32>}, {pipeline_mode = #tpu.pipeline_mode<synchronous>, transform_indices = @transform_4, window_bounds = array<i64: 1, 32>}, {pipeline_mode = #tpu.pipeline_mode<synchronous>, transform_indices = @transform_5, window_bounds = array<i64: 32, 64>}, {pipeline_mode = #tpu.pipeline_mode<synchronous>, transform_indices = @transform_6, window_bounds = array<i64: 1, 64>}, {pipeline_mode = #tpu.pipeline_mode<synchronous>, transform_indices = @transform_7, window_bounds = array<i64: 64, 32>}, {pipeline_mode = #tpu.pipeline_mode<synchronous>, transform_indices = @transform_8, window_bounds = array<i64: 1, 32>}, {pipeline_mode = #tpu.pipeline_mode<synchronous>, transform_indices = @transform_9, window_bounds = array<i64: 1, 32>}, {pipeline_mode = #tpu.pipeline_mode<synchronous>, transform_indices = @transform_10, window_bounds = array<i64: 1, 32>}, {pipeline_mode = #tpu.pipeline_mode<synchronous>, transform_indices = @transform_11, window_bounds = array<i64: 1, 32>}, {pipeline_mode = #tpu.pipeline_mode<synchronous>, transform_indices = @transform_12, window_bounds = array<i64: 1, 32>}, {pipeline_mode = #tpu.pipeline_mode<synchronous>, transform_indices = @transform_13, window_bounds = array<i64: 1, 32>}, {pipeline_mode = #tpu.pipeline_mode<synchronous>, transform_indices = @transform_14, window_bounds = array<i64: 1, 32>}, {transform_indices = @transform_15, window_bounds = array<i64: 1, 8, 32>}]} {
    %c0_i32 = arith.constant 0 : i32
    %0 = arith.cmpi eq, %arg1, %c0_i32 : i32
    %1 = arith.extui %0 : i1 to i32
    %c0_i32_0 = arith.constant 0 : i32
    %2 = arith.cmpi ne, %1, %c0_i32_0 : i32
    scf.if %2 {
      %c0_102 = arith.constant 0 : index
      %c0_103 = arith.constant 0 : index
      %c0_104 = arith.constant 0 : index
      %174 = vector.load %arg2[%c0_102, %c0_103, %c0_104] : memref<1x8x32xf32, #tpu.memory_space<vmem>>, vector<1x8x32xf32>
      %c0_105 = arith.constant 0 : index
      %c0_106 = arith.constant 0 : index
      %c0_107 = arith.constant 0 : index
      %175 = vector.load %arg18[%c0_105, %c0_106, %c0_107] : memref<1x8x32xf32, #tpu.memory_space<vmem>>, vector<1x8x32xf32>
      tpu.vector_store %arg18[%c0_105, %c0_106, %c0_107], %174 {strides = array<i32>} : memref<1x8x32xf32, #tpu.memory_space<vmem>>, vector<1x8x32xf32>,
    } else {
    }
    %c0 = arith.constant 0 : index
    %c0_1 = arith.constant 0 : index
    %c0_2 = arith.constant 0 : index
    %3 = vector.load %arg18[%c0, %c0_1, %c0_2] : memref<1x8x32xf32, #tpu.memory_space<vmem>>, vector<1x8x32xf32>
    %4 = vector.shape_cast %3 : vector<1x8x32xf32> to vector<8x32xf32>
    %5 = arith.truncf %4 : vector<8x32xf32> to vector<8x32xbf16>
    %c0_3 = arith.constant 0 : index
    %c0_4 = arith.constant 0 : index
    %6 = vector.load %arg3[%c0_3, %c0_4] : memref<32x96xbf16, #tpu.memory_space<vmem>>, vector<32x96xbf16>
    %cst = arith.constant dense<0.000000e+00> : vector<8x96xf32>
    %7 = tpu.matmul %5, %6, %cst {dimension_numbers = #tpu.dot_dimension_numbers<[1], [0], [0], [1], [0, 0, 1, 1], [], []>} : vector<8x32xbf16>, vector<32x96xbf16>, vector<8x96xf32> -> vector<8x96xf32>
    %c0_5 = arith.constant 0 : index
    %c0_6 = arith.constant 0 : index
    %8 = vector.load %arg4[%c0_5, %c0_6] : memref<1x96xf32, #tpu.memory_space<vmem>>, vector<1x96xf32>
    %9 = vector.broadcast %8 : vector<1x96xf32> to vector<8x96xf32>
    %10 = arith.addf %7, %9 : vector<8x96xf32>
    %11 = vector.extract_strided_slice %10 {offsets = [0, 0], sizes = [8, 8], strides = [1, 1]} : vector<8x96xf32> to vector<8x8xf32>
    %cst_7 = arith.constant 0.353553385 : f32
    %12 = vector.broadcast %cst_7 : f32 to vector<8x8xf32>
    %13 = arith.mulf %11, %12 : vector<8x8xf32>
    %14 = vector.shape_cast %13 : vector<8x8xf32> to vector<1x8x8xf32>
    %15 = arith.truncf %14 : vector<1x8x8xf32> to vector<1x8x8xbf16>
    %c0_8 = arith.constant 0 : index
    %c0_9 = arith.constant 0 : index
    %c0_10 = arith.constant 0 : index
    %16 = vector.load %arg19[%c0_8, %c0_9, %c0_10] : memref<4x8x8xbf16, #tpu.memory_space<vmem>>, vector<1x8x8xbf16>
    tpu.vector_store %arg19[%c0_8, %c0_9, %c0_10], %15 {strides = array<i32>} : memref<4x8x8xbf16, #tpu.memory_space<vmem>>, vector<1x8x8xbf16>,
    %17 = vector.extract_strided_slice %10 {offsets = [0, 32], sizes = [8, 8], strides = [1, 1]} : vector<8x96xf32> to vector<8x8xf32>
    %18 = vector.shape_cast %17 : vector<8x8xf32> to vector<1x8x8xf32>
    %19 = arith.truncf %18 : vector<1x8x8xf32> to vector<1x8x8xbf16>
    %c0_11 = arith.constant 0 : index
    %c0_12 = arith.constant 0 : index
    %c0_13 = arith.constant 0 : index
    %20 = vector.load %arg20[%c0_11, %c0_12, %c0_13] : memref<4x8x8xbf16, #tpu.memory_space<vmem>>, vector<1x8x8xbf16>
    tpu.vector_store %arg20[%c0_11, %c0_12, %c0_13], %19 {strides = array<i32>} : memref<4x8x8xbf16, #tpu.memory_space<vmem>>, vector<1x8x8xbf16>,
    %21 = vector.extract_strided_slice %10 {offsets = [0, 64], sizes = [8, 8], strides = [1, 1]} : vector<8x96xf32> to vector<8x8xf32>
    %22 = vector.shape_cast %21 : vector<8x8xf32> to vector<1x8x8xf32>
    %23 = arith.truncf %22 : vector<1x8x8xf32> to vector<1x8x8xbf16>
    %c0_14 = arith.constant 0 : index
    %c0_15 = arith.constant 0 : index
    %c0_16 = arith.constant 0 : index
    %24 = vector.load %arg21[%c0_14, %c0_15, %c0_16] : memref<4x8x8xbf16, #tpu.memory_space<vmem>>, vector<1x8x8xbf16>
    tpu.vector_store %arg21[%c0_14, %c0_15, %c0_16], %23 {strides = array<i32>} : memref<4x8x8xbf16, #tpu.memory_space<vmem>>, vector<1x8x8xbf16>,
    %25 = vector.extract_strided_slice %10 {offsets = [0, 8], sizes = [8, 8], strides = [1, 1]} : vector<8x96xf32> to vector<8x8xf32>
    %cst_17 = arith.constant 0.353553385 : f32
    %26 = vector.broadcast %cst_17 : f32 to vector<8x8xf32>
    %27 = arith.mulf %25, %26 : vector<8x8xf32>
    %28 = vector.shape_cast %27 : vector<8x8xf32> to vector<1x8x8xf32>
    %29 = arith.truncf %28 : vector<1x8x8xf32> to vector<1x8x8xbf16>
    %c1 = arith.constant 1 : index
    %c0_18 = arith.constant 0 : index
    %c0_19 = arith.constant 0 : index
    %30 = vector.load %arg19[%c1, %c0_18, %c0_19] : memref<4x8x8xbf16, #tpu.memory_space<vmem>>, vector<1x8x8xbf16>
    tpu.vector_store %arg19[%c1, %c0_18, %c0_19], %29 {strides = array<i32>} : memref<4x8x8xbf16, #tpu.memory_space<vmem>>, vector<1x8x8xbf16>,
    %31 = vector.extract_strided_slice %10 {offsets = [0, 40], sizes = [8, 8], strides = [1, 1]} : vector<8x96xf32> to vector<8x8xf32>
    %32 = vector.shape_cast %31 : vector<8x8xf32> to vector<1x8x8xf32>
    %33 = arith.truncf %32 : vector<1x8x8xf32> to vector<1x8x8xbf16>
    %c1_20 = arith.constant 1 : index
    %c0_21 = arith.constant 0 : index
    %c0_22 = arith.constant 0 : index
    %34 = vector.load %arg20[%c1_20, %c0_21, %c0_22] : memref<4x8x8xbf16, #tpu.memory_space<vmem>>, vector<1x8x8xbf16>
    tpu.vector_store %arg20[%c1_20, %c0_21, %c0_22], %33 {strides = array<i32>} : memref<4x8x8xbf16, #tpu.memory_space<vmem>>, vector<1x8x8xbf16>,
    %35 = vector.extract_strided_slice %10 {offsets = [0, 72], sizes = [8, 8], strides = [1, 1]} : vector<8x96xf32> to vector<8x8xf32>
    %36 = vector.shape_cast %35 : vector<8x8xf32> to vector<1x8x8xf32>
    %37 = arith.truncf %36 : vector<1x8x8xf32> to vector<1x8x8xbf16>
    %c1_23 = arith.constant 1 : index
    %c0_24 = arith.constant 0 : index
    %c0_25 = arith.constant 0 : index
    %38 = vector.load %arg21[%c1_23, %c0_24, %c0_25] : memref<4x8x8xbf16, #tpu.memory_space<vmem>>, vector<1x8x8xbf16>
    tpu.vector_store %arg21[%c1_23, %c0_24, %c0_25], %37 {strides = array<i32>} : memref<4x8x8xbf16, #tpu.memory_space<vmem>>, vector<1x8x8xbf16>,
    %39 = vector.extract_strided_slice %10 {offsets = [0, 16], sizes = [8, 8], strides = [1, 1]} : vector<8x96xf32> to vector<8x8xf32>
    %cst_26 = arith.constant 0.353553385 : f32
    %40 = vector.broadcast %cst_26 : f32 to vector<8x8xf32>
    %41 = arith.mulf %39, %40 : vector<8x8xf32>
    %42 = vector.shape_cast %41 : vector<8x8xf32> to vector<1x8x8xf32>
    %43 = arith.truncf %42 : vector<1x8x8xf32> to vector<1x8x8xbf16>
    %c2 = arith.constant 2 : index
    %c0_27 = arith.constant 0 : index
    %c0_28 = arith.constant 0 : index
    %44 = vector.load %arg19[%c2, %c0_27, %c0_28] : memref<4x8x8xbf16, #tpu.memory_space<vmem>>, vector<1x8x8xbf16>
    tpu.vector_store %arg19[%c2, %c0_27, %c0_28], %43 {strides = array<i32>} : memref<4x8x8xbf16, #tpu.memory_space<vmem>>, vector<1x8x8xbf16>,
    %45 = vector.extract_strided_slice %10 {offsets = [0, 48], sizes = [8, 8], strides = [1, 1]} : vector<8x96xf32> to vector<8x8xf32>
    %46 = vector.shape_cast %45 : vector<8x8xf32> to vector<1x8x8xf32>
    %47 = arith.truncf %46 : vector<1x8x8xf32> to vector<1x8x8xbf16>
    %c2_29 = arith.constant 2 : index
    %c0_30 = arith.constant 0 : index
    %c0_31 = arith.constant 0 : index
    %48 = vector.load %arg20[%c2_29, %c0_30, %c0_31] : memref<4x8x8xbf16, #tpu.memory_space<vmem>>, vector<1x8x8xbf16>
    tpu.vector_store %arg20[%c2_29, %c0_30, %c0_31], %47 {strides = array<i32>} : memref<4x8x8xbf16, #tpu.memory_space<vmem>>, vector<1x8x8xbf16>,
    %49 = vector.extract_strided_slice %10 {offsets = [0, 80], sizes = [8, 8], strides = [1, 1]} : vector<8x96xf32> to vector<8x8xf32>
    %50 = vector.shape_cast %49 : vector<8x8xf32> to vector<1x8x8xf32>
    %51 = arith.truncf %50 : vector<1x8x8xf32> to vector<1x8x8xbf16>
    %c2_32 = arith.constant 2 : index
    %c0_33 = arith.constant 0 : index
    %c0_34 = arith.constant 0 : index
    %52 = vector.load %arg21[%c2_32, %c0_33, %c0_34] : memref<4x8x8xbf16, #tpu.memory_space<vmem>>, vector<1x8x8xbf16>
    tpu.vector_store %arg21[%c2_32, %c0_33, %c0_34], %51 {strides = array<i32>} : memref<4x8x8xbf16, #tpu.memory_space<vmem>>, vector<1x8x8xbf16>,
    %53 = vector.extract_strided_slice %10 {offsets = [0, 24], sizes = [8, 8], strides = [1, 1]} : vector<8x96xf32> to vector<8x8xf32>
    %cst_35 = arith.constant 0.353553385 : f32
    %54 = vector.broadcast %cst_35 : f32 to vector<8x8xf32>
    %55 = arith.mulf %53, %54 : vector<8x8xf32>
    %56 = vector.shape_cast %55 : vector<8x8xf32> to vector<1x8x8xf32>
    %57 = arith.truncf %56 : vector<1x8x8xf32> to vector<1x8x8xbf16>
    %c3 = arith.constant 3 : index
    %c0_36 = arith.constant 0 : index
    %c0_37 = arith.constant 0 : index
    %58 = vector.load %arg19[%c3, %c0_36, %c0_37] : memref<4x8x8xbf16, #tpu.memory_space<vmem>>, vector<1x8x8xbf16>
    tpu.vector_store %arg19[%c3, %c0_36, %c0_37], %57 {strides = array<i32>} : memref<4x8x8xbf16, #tpu.memory_space<vmem>>, vector<1x8x8xbf16>,
    %59 = vector.extract_strided_slice %10 {offsets = [0, 56], sizes = [8, 8], strides = [1, 1]} : vector<8x96xf32> to vector<8x8xf32>
    %60 = vector.shape_cast %59 : vector<8x8xf32> to vector<1x8x8xf32>
    %61 = arith.truncf %60 : vector<1x8x8xf32> to vector<1x8x8xbf16>
    %c3_38 = arith.constant 3 : index
    %c0_39 = arith.constant 0 : index
    %c0_40 = arith.constant 0 : index
    %62 = vector.load %arg20[%c3_38, %c0_39, %c0_40] : memref<4x8x8xbf16, #tpu.memory_space<vmem>>, vector<1x8x8xbf16>
    tpu.vector_store %arg20[%c3_38, %c0_39, %c0_40], %61 {strides = array<i32>} : memref<4x8x8xbf16, #tpu.memory_space<vmem>>, vector<1x8x8xbf16>,
    %63 = vector.extract_strided_slice %10 {offsets = [0, 88], sizes = [8, 8], strides = [1, 1]} : vector<8x96xf32> to vector<8x8xf32>
    %64 = vector.shape_cast %63 : vector<8x8xf32> to vector<1x8x8xf32>
    %65 = arith.truncf %64 : vector<1x8x8xf32> to vector<1x8x8xbf16>
    %c3_41 = arith.constant 3 : index
    %c0_42 = arith.constant 0 : index
    %c0_43 = arith.constant 0 : index
    %66 = vector.load %arg21[%c3_41, %c0_42, %c0_43] : memref<4x8x8xbf16, #tpu.memory_space<vmem>>, vector<1x8x8xbf16>
    tpu.vector_store %arg21[%c3_41, %c0_42, %c0_43], %65 {strides = array<i32>} : memref<4x8x8xbf16, #tpu.memory_space<vmem>>, vector<1x8x8xbf16>,
    %c0_44 = arith.constant 0 : index
    %c0_45 = arith.constant 0 : index
    %c0_46 = arith.constant 0 : index
    %67 = vector.load %arg19[%c0_44, %c0_45, %c0_46] : memref<4x8x8xbf16, #tpu.memory_space<vmem>>, vector<4x8x8xbf16>
    %c0_47 = arith.constant 0 : index
    %c0_48 = arith.constant 0 : index
    %c0_49 = arith.constant 0 : index
    %68 = vector.load %arg20[%c0_47, %c0_48, %c0_49] : memref<4x8x8xbf16, #tpu.memory_space<vmem>>, vector<4x8x8xbf16>
    %c0_50 = arith.constant 0 : index
    %c0_51 = arith.constant 0 : index
    %c0_52 = arith.constant 0 : index
    %69 = vector.load %arg21[%c0_50, %c0_51, %c0_52] : memref<4x8x8xbf16, #tpu.memory_space<vmem>>, vector<4x8x8xbf16>
    %cst_53 = arith.constant dense<0.000000e+00> : vector<4x8x8xf32>
    %70 = tpu.matmul %67, %68, %cst_53 {dimension_numbers = #tpu.dot_dimension_numbers<[2], [2], [1], [1], [0, 0, 0, 1, 1, 1], [0], [0]>} : vector<4x8x8xbf16>, vector<4x8x8xbf16>, vector<4x8x8xf32> -> vector<4x8x8xf32>
    %cst_54 = arith.constant dense<0xFF800000> : vector<4x8xf32>
    %71 = vector.multi_reduction <maximumf>, %70, %cst_54 [2] : vector<4x8x8xf32> to vector<4x8xf32>
    %72 = vector.shape_cast %71 : vector<4x8xf32> to vector<4x8x1xf32>
    %73 = vector.broadcast %72 : vector<4x8x1xf32> to vector<4x8x8xf32>
    %74 = arith.subf %70, %73 : vector<4x8x8xf32>
    %75 = math.exp %74 : vector<4x8x8xf32>
    %cst_55 = arith.constant dense<0.000000e+00> : vector<4x8xf32>
    %76 = vector.multi_reduction <add>, %75, %cst_55 [2] : vector<4x8x8xf32> to vector<4x8xf32>
    %77 = vector.shape_cast %76 : vector<4x8xf32> to vector<4x8x1xf32>
    %78 = tpu.reciprocal %77 {approx = true} : vector<4x8x1xf32> -> vector<4x8x1xf32>
    %79 = vector.broadcast %78 : vector<4x8x1xf32> to vector<4x8x8xf32>
    %80 = arith.mulf %75, %79 : vector<4x8x8xf32>
    %81 = arith.truncf %80 : vector<4x8x8xf32> to vector<4x8x8xbf16>
    %cst_56 = arith.constant dense<0.000000e+00> : vector<4x8x8xf32>
    %82 = tpu.matmul %81, %69, %cst_56 {dimension_numbers = #tpu.dot_dimension_numbers<[2], [1], [1], [2], [0, 0, 0, 1, 1, 2], [0], [0]>} : vector<4x8x8xbf16>, vector<4x8x8xbf16>, vector<4x8x8xf32> -> vector<4x8x8xf32>
    %83 = vector.extract_strided_slice %82 {offsets = [0, 0, 0], sizes = [1, 8, 8], strides = [1, 1, 1]} : vector<4x8x8xf32> to vector<1x8x8xf32>
    %84 = vector.shape_cast %83 : vector<1x8x8xf32> to vector<8x8xf32>
    %85 = arith.truncf %84 : vector<8x8xf32> to vector<8x8xbf16>
    %c0_57 = arith.constant 0 : index
    %c0_58 = arith.constant 0 : index
    %86 = vector.load %arg22[%c0_57, %c0_58] : memref<8x32xbf16, #tpu.memory_space<vmem>>, vector<8x8xbf16>
    tpu.vector_store %arg22[%c0_57, %c0_58], %85 {strides = array<i32>} : memref<8x32xbf16, #tpu.memory_space<vmem>>, vector<8x8xbf16>,
    %87 = vector.extract_strided_slice %82 {offsets = [1, 0, 0], sizes = [1, 8, 8], strides = [1, 1, 1]} : vector<4x8x8xf32> to vector<1x8x8xf32>
    %88 = vector.shape_cast %87 : vector<1x8x8xf32> to vector<8x8xf32>
    %89 = arith.truncf %88 : vector<8x8xf32> to vector<8x8xbf16>
    %c0_59 = arith.constant 0 : index
    %c8 = arith.constant 8 : index
    %90 = vector.load %arg22[%c0_59, %c8] : memref<8x32xbf16, #tpu.memory_space<vmem>>, vector<8x8xbf16>
    tpu.vector_store %arg22[%c0_59, %c8], %89 {strides = array<i32>} : memref<8x32xbf16, #tpu.memory_space<vmem>>, vector<8x8xbf16>,
    %91 = vector.extract_strided_slice %82 {offsets = [2, 0, 0], sizes = [1, 8, 8], strides = [1, 1, 1]} : vector<4x8x8xf32> to vector<1x8x8xf32>
    %92 = vector.shape_cast %91 : vector<1x8x8xf32> to vector<8x8xf32>
    %93 = arith.truncf %92 : vector<8x8xf32> to vector<8x8xbf16>
    %c0_60 = arith.constant 0 : index
    %c16 = arith.constant 16 : index
    %94 = vector.load %arg22[%c0_60, %c16] : memref<8x32xbf16, #tpu.memory_space<vmem>>, vector<8x8xbf16>
    tpu.vector_store %arg22[%c0_60, %c16], %93 {strides = array<i32>} : memref<8x32xbf16, #tpu.memory_space<vmem>>, vector<8x8xbf16>,
    %95 = vector.extract_strided_slice %82 {offsets = [3, 0, 0], sizes = [1, 8, 8], strides = [1, 1, 1]} : vector<4x8x8xf32> to vector<1x8x8xf32>
    %96 = vector.shape_cast %95 : vector<1x8x8xf32> to vector<8x8xf32>
    %97 = arith.truncf %96 : vector<8x8xf32> to vector<8x8xbf16>
    %c0_61 = arith.constant 0 : index
    %c24 = arith.constant 24 : index
    %98 = vector.load %arg22[%c0_61, %c24] : memref<8x32xbf16, #tpu.memory_space<vmem>>, vector<8x8xbf16>
    tpu.vector_store %arg22[%c0_61, %c24], %97 {strides = array<i32>} : memref<8x32xbf16, #tpu.memory_space<vmem>>, vector<8x8xbf16>,
    %c0_62 = arith.constant 0 : index
    %c0_63 = arith.constant 0 : index
    %99 = vector.load %arg22[%c0_62, %c0_63] : memref<8x32xbf16, #tpu.memory_space<vmem>>, vector<8x32xbf16>
    %c0_64 = arith.constant 0 : index
    %c0_65 = arith.constant 0 : index
    %100 = vector.load %arg5[%c0_64, %c0_65] : memref<32x32xbf16, #tpu.memory_space<vmem>>, vector<32x32xbf16>
    %cst_66 = arith.constant dense<0.000000e+00> : vector<8x32xf32>
    %101 = tpu.matmul %99, %100, %cst_66 {dimension_numbers = #tpu.dot_dimension_numbers<[1], [0], [0], [1], [0, 0, 1, 1], [], []>} : vector<8x32xbf16>, vector<32x32xbf16>, vector<8x32xf32> -> vector<8x32xf32>
    %c0_67 = arith.constant 0 : index
    %c0_68 = arith.constant 0 : index
    %102 = vector.load %arg6[%c0_67, %c0_68] : memref<1x32xf32, #tpu.memory_space<vmem>>, vector<1x32xf32>
    %103 = vector.broadcast %102 : vector<1x32xf32> to vector<8x32xf32>
    %104 = arith.addf %101, %103 : vector<8x32xf32>
    %105 = arith.addf %4, %104 : vector<8x32xf32>
    %c0_69 = arith.constant 0 : index
    %c0_70 = arith.constant 0 : index
    %106 = vector.load %arg11[%c0_69, %c0_70] : memref<1x32xf32, #tpu.memory_space<vmem>>, vector<1x32xf32>
    %c0_71 = arith.constant 0 : index
    %c0_72 = arith.constant 0 : index
    %107 = vector.load %arg12[%c0_71, %c0_72] : memref<1x32xf32, #tpu.memory_space<vmem>>, vector<1x32xf32>
    %cst_73 = arith.constant dense<0.000000e+00> : vector<8xf32>
    %108 = vector.multi_reduction <add>, %105, %cst_73 [1] : vector<8x32xf32> to vector<8xf32>
    %109 = vector.shape_cast %108 : vector<8xf32> to vector<8x1xf32>
    %cst_74 = arith.constant 3.200000e+01 : f32
    %110 = vector.broadcast %cst_74 : f32 to vector<8x1xf32>
    %111 = arith.divf %109, %110 : vector<8x1xf32>
    %112 = vector.broadcast %111 : vector<8x1xf32> to vector<8x32xf32>
    %113 = arith.subf %105, %112 : vector<8x32xf32>
    %114 = arith.mulf %113, %113 : vector<8x32xf32>
    %cst_75 = arith.constant dense<0.000000e+00> : vector<8xf32>
    %115 = vector.multi_reduction <add>, %114, %cst_75 [1] : vector<8x32xf32> to vector<8xf32>
    %116 = vector.shape_cast %115 : vector<8xf32> to vector<8x1xf32>
    %cst_76 = arith.constant 3.200000e+01 : f32
    %117 = vector.broadcast %cst_76 : f32 to vector<8x1xf32>
    %118 = arith.divf %116, %117 : vector<8x1xf32>
    %119 = vector.broadcast %111 : vector<8x1xf32> to vector<8x32xf32>
    %120 = arith.subf %105, %119 : vector<8x32xf32>
    %cst_77 = arith.constant 9.99999974E-6 : f32
    %121 = vector.broadcast %cst_77 : f32 to vector<8x1xf32>
    %122 = arith.addf %118, %121 : vector<8x1xf32>
    %123 = math.rsqrt %122 : vector<8x1xf32>
    %124 = vector.broadcast %123 : vector<8x1xf32> to vector<8x32xf32>
    %125 = arith.mulf %120, %124 : vector<8x32xf32>
    %126 = vector.broadcast %106 : vector<1x32xf32> to vector<8x32xf32>
    %127 = arith.mulf %125, %126 : vector<8x32xf32>
    %128 = vector.broadcast %107 : vector<1x32xf32> to vector<8x32xf32>
    %129 = arith.addf %127, %128 : vector<8x32xf32>
    %130 = arith.truncf %129 : vector<8x32xf32> to vector<8x32xbf16>
    %c0_78 = arith.constant 0 : index
    %c0_79 = arith.constant 0 : index
    %131 = vector.load %arg7[%c0_78, %c0_79] : memref<32x64xbf16, #tpu.memory_space<vmem>>, vector<32x64xbf16>
    %cst_80 = arith.constant dense<0.000000e+00> : vector<8x64xf32>
    %132 = tpu.matmul %130, %131, %cst_80 {dimension_numbers = #tpu.dot_dimension_numbers<[1], [0], [0], [1], [0, 0, 1, 1], [], []>} : vector<8x32xbf16>, vector<32x64xbf16>, vector<8x64xf32> -> vector<8x64xf32>
    %c0_81 = arith.constant 0 : index
    %c0_82 = arith.constant 0 : index
    %133 = vector.load %arg8[%c0_81, %c0_82] : memref<1x64xf32, #tpu.memory_space<vmem>>, vector<1x64xf32>
    %134 = vector.broadcast %133 : vector<1x64xf32> to vector<8x64xf32>
    %135 = arith.addf %132, %134 : vector<8x64xf32>
    %cst_83 = arith.constant 0.000000e+00 : f32
    %136 = vector.broadcast %cst_83 : f32 to vector<8x64xf32>
    %137 = arith.maximumf %135, %136 : vector<8x64xf32>
    %138 = arith.truncf %137 : vector<8x64xf32> to vector<8x64xbf16>
    %c0_84 = arith.constant 0 : index
    %c0_85 = arith.constant 0 : index
    %139 = vector.load %arg9[%c0_84, %c0_85] : memref<64x32xbf16, #tpu.memory_space<vmem>>, vector<64x32xbf16>
    %cst_86 = arith.constant dense<0.000000e+00> : vector<8x32xf32>
    %140 = tpu.matmul %138, %139, %cst_86 {dimension_numbers = #tpu.dot_dimension_numbers<[1], [0], [0], [1], [0, 0, 1, 1], [], []>} : vector<8x64xbf16>, vector<64x32xbf16>, vector<8x32xf32> -> vector<8x32xf32>
    %c0_87 = arith.constant 0 : index
    %c0_88 = arith.constant 0 : index
    %141 = vector.load %arg10[%c0_87, %c0_88] : memref<1x32xf32, #tpu.memory_space<vmem>>, vector<1x32xf32>
    %142 = vector.broadcast %141 : vector<1x32xf32> to vector<8x32xf32>
    %143 = arith.addf %140, %142 : vector<8x32xf32>
    %144 = arith.addf %129, %143 : vector<8x32xf32>
    %c0_89 = arith.constant 0 : index
    %c0_90 = arith.constant 0 : index
    %145 = vector.load %arg13[%c0_89, %c0_90] : memref<1x32xf32, #tpu.memory_space<vmem>>, vector<1x32xf32>
    %c0_91 = arith.constant 0 : index
    %c0_92 = arith.constant 0 : index
    %146 = vector.load %arg14[%c0_91, %c0_92] : memref<1x32xf32, #tpu.memory_space<vmem>>, vector<1x32xf32>
    %cst_93 = arith.constant dense<0.000000e+00> : vector<8xf32>
    %147 = vector.multi_reduction <add>, %144, %cst_93 [1] : vector<8x32xf32> to vector<8xf32>
    %148 = vector.shape_cast %147 : vector<8xf32> to vector<8x1xf32>
    %cst_94 = arith.constant 3.200000e+01 : f32
    %149 = vector.broadcast %cst_94 : f32 to vector<8x1xf32>
    %150 = arith.divf %148, %149 : vector<8x1xf32>
    %151 = vector.broadcast %150 : vector<8x1xf32> to vector<8x32xf32>
    %152 = arith.subf %144, %151 : vector<8x32xf32>
    %153 = arith.mulf %152, %152 : vector<8x32xf32>
    %cst_95 = arith.constant dense<0.000000e+00> : vector<8xf32>
    %154 = vector.multi_reduction <add>, %153, %cst_95 [1] : vector<8x32xf32> to vector<8xf32>
    %155 = vector.shape_cast %154 : vector<8xf32> to vector<8x1xf32>
    %cst_96 = arith.constant 3.200000e+01 : f32
    %156 = vector.broadcast %cst_96 : f32 to vector<8x1xf32>
    %157 = arith.divf %155, %156 : vector<8x1xf32>
    %158 = vector.broadcast %150 : vector<8x1xf32> to vector<8x32xf32>
    %159 = arith.subf %144, %158 : vector<8x32xf32>
    %cst_97 = arith.constant 9.99999974E-6 : f32
    %160 = vector.broadcast %cst_97 : f32 to vector<8x1xf32>
    %161 = arith.addf %157, %160 : vector<8x1xf32>
    %162 = math.rsqrt %161 : vector<8x1xf32>
    %163 = vector.broadcast %162 : vector<8x1xf32> to vector<8x32xf32>
    %164 = arith.mulf %159, %163 : vector<8x32xf32>
    %165 = vector.broadcast %145 : vector<1x32xf32> to vector<8x32xf32>
    %166 = arith.mulf %164, %165 : vector<8x32xf32>
    %167 = vector.broadcast %146 : vector<1x32xf32> to vector<8x32xf32>
    %168 = arith.addf %166, %167 : vector<8x32xf32>
    %169 = vector.shape_cast %168 : vector<8x32xf32> to vector<1x8x32xf32>
    %c0_98 = arith.constant 0 : index
    %c0_99 = arith.constant 0 : index
    %c0_100 = arith.constant 0 : index
    %170 = vector.load %arg18[%c0_98, %c0_99, %c0_100] : memref<1x8x32xf32, #tpu.memory_space<vmem>>, vector<1x8x32xf32>
    tpu.vector_store %arg18[%c0_98, %c0_99, %c0_100], %169 {strides = array<i32>} : memref<1x8x32xf32, #tpu.memory_space<vmem>>, vector<1x8x32xf32>,
    %c1_i32 = arith.constant 1 : i32
    %171 = arith.cmpi eq, %arg1, %c1_i32 : i32
    %172 = arith.extui %171 : i1 to i32
    %c0_i32_101 = arith.constant 0 : i32
    %173 = arith.cmpi ne, %172, %c0_i32_101 : i32
    scf.if %173 {
      %c0_102 = arith.constant 0 : index
      %c0_103 = arith.constant 0 : index
      %c0_104 = arith.constant 0 : index
      %174 = vector.load %arg18[%c0_102, %c0_103, %c0_104] : memref<1x8x32xf32, #tpu.memory_space<vmem>>, vector<1x8x32xf32>
      %c0_105 = arith.constant 0 : index
      %c0_106 = arith.constant 0 : index
      %175 = vector.load %arg15[%c0_105, %c0_106] : memref<1x32xf32, #tpu.memory_space<vmem>>, vector<1x32xf32>
      %c0_107 = arith.constant 0 : index
      %c0_108 = arith.constant 0 : index
      %176 = vector.load %arg16[%c0_107, %c0_108] : memref<1x32xf32, #tpu.memory_space<vmem>>, vector<1x32xf32>
      %cst_109 = arith.constant dense<0.000000e+00> : vector<1x8xf32>
      %177 = vector.multi_reduction <add>, %174, %cst_109 [2] : vector<1x8x32xf32> to vector<1x8xf32>
      %178 = vector.shape_cast %177 : vector<1x8xf32> to vector<1x8x1xf32>
      %cst_110 = arith.constant 3.200000e+01 : f32
      %179 = vector.broadcast %cst_110 : f32 to vector<1x8x1xf32>
      %180 = arith.divf %178, %179 : vector<1x8x1xf32>
      %181 = vector.broadcast %180 : vector<1x8x1xf32> to vector<1x8x32xf32>
      %182 = arith.subf %174, %181 : vector<1x8x32xf32>
      %183 = arith.mulf %182, %182 : vector<1x8x32xf32>
      %cst_111 = arith.constant dense<0.000000e+00> : vector<1x8xf32>
      %184 = vector.multi_reduction <add>, %183, %cst_111 [2] : vector<1x8x32xf32> to vector<1x8xf32>
      %185 = vector.shape_cast %184 : vector<1x8xf32> to vector<1x8x1xf32>
      %cst_112 = arith.constant 3.200000e+01 : f32
      %186 = vector.broadcast %cst_112 : f32 to vector<1x8x1xf32>
      %187 = arith.divf %185, %186 : vector<1x8x1xf32>
      %188 = vector.broadcast %180 : vector<1x8x1xf32> to vector<1x8x32xf32>
      %189 = arith.subf %174, %188 : vector<1x8x32xf32>
      %cst_113 = arith.constant 9.99999974E-6 : f32
      %190 = vector.broadcast %cst_113 : f32 to vector<1x8x1xf32>
      %191 = arith.addf %187, %190 : vector<1x8x1xf32>
      %192 = math.rsqrt %191 : vector<1x8x1xf32>
      %193 = vector.broadcast %192 : vector<1x8x1xf32> to vector<1x8x32xf32>
      %194 = arith.mulf %189, %193 : vector<1x8x32xf32>
      %195 = vector.shape_cast %175 : vector<1x32xf32> to vector<1x1x32xf32>
      %196 = vector.broadcast %195 : vector<1x1x32xf32> to vector<1x8x32xf32>
      %197 = arith.mulf %194, %196 : vector<1x8x32xf32>
      %198 = vector.shape_cast %176 : vector<1x32xf32> to vector<1x1x32xf32>
      %199 = vector.broadcast %198 : vector<1x1x32xf32> to vector<1x8x32xf32>
      %200 = arith.addf %197, %199 : vector<1x8x32xf32>
      %c0_114 = arith.constant 0 : index
      %c0_115 = arith.constant 0 : index
      %c0_116 = arith.constant 0 : index
      %201 = vector.load %arg17[%c0_114, %c0_115, %c0_116] : memref<1x8x32xf32, #tpu.memory_space<vmem>>, vector<1x8x32xf32>
      tpu.vector_store %arg17[%c0_114, %c0_115, %c0_116], %200 {strides = array<i32>} : memref<1x8x32xf32, #tpu.memory_space<vmem>>, vector<1x8x32xf32>,
    } else {
    }
    return
  }
  func.func @transform_0(%arg0: i32, %arg1: i32) -> (i32, i32, i32) {
    %c0_i32 = arith.constant 0 : i32
    %c0_i32_0 = arith.constant 0 : i32
    %c0_i32_1 = arith.constant 0 : i32
    return %arg0, %c0_i32, %c0_i32_0 : i32, i32, i32
  }
  func.func @transform_1(%arg0: i32, %arg1: i32) -> (i32, i32) {
    %c0_i32 = arith.constant 0 : i32
    %c0_i32_0 = arith.constant 0 : i32
    %c0_i32_1 = arith.constant 0 : i32
    return %c0_i32, %c0_i32_0 : i32, i32
  }
  func.func @transform_2(%arg0: i32, %arg1: i32) -> (i32, i32) {
    %c0_i32 = arith.constant 0 : i32
    %c0_i32_0 = arith.constant 0 : i32
    %c0_i32_1 = arith.constant 0 : i32
    return %c0_i32, %c0_i32_0 : i32, i32
  }
  func.func @transform_3(%arg0: i32, %arg1: i32) -> (i32, i32) {
    %c0_i32 = arith.constant 0 : i32
    %c0_i32_0 = arith.constant 0 : i32
    %c0_i32_1 = arith.constant 0 : i32
    return %c0_i32, %c0_i32_0 : i32, i32
  }
  func.func @transform_4(%arg0: i32, %arg1: i32) -> (i32, i32) {
    %c0_i32 = arith.constant 0 : i32
    %c0_i32_0 = arith.constant 0 : i32
    %c0_i32_1 = arith.constant 0 : i32
    return %c0_i32, %c0_i32_0 : i32, i32
  }
  func.func @transform_5(%arg0: i32, %arg1: i32) -> (i32, i32) {
    %c0_i32 = arith.constant 0 : i32
    %c0_i32_0 = arith.constant 0 : i32
    %c0_i32_1 = arith.constant 0 : i32
    return %c0_i32, %c0_i32_0 : i32, i32
  }
  func.func @transform_6(%arg0: i32, %arg1: i32) -> (i32, i32) {
    %c0_i32 = arith.constant 0 : i32
    %c0_i32_0 = arith.constant 0 : i32
    %c0_i32_1 = arith.constant 0 : i32
    return %c0_i32, %c0_i32_0 : i32, i32
  }
  func.func @transform_7(%arg0: i32, %arg1: i32) -> (i32, i32) {
    %c0_i32 = arith.constant 0 : i32
    %c0_i32_0 = arith.constant 0 : i32
    %c0_i32_1 = arith.constant 0 : i32
    return %c0_i32, %c0_i32_0 : i32, i32
  }
  func.func @transform_8(%arg0: i32, %arg1: i32) -> (i32, i32) {
    %c0_i32 = arith.constant 0 : i32
    %c0_i32_0 = arith.constant 0 : i32
    %c0_i32_1 = arith.constant 0 : i32
    return %c0_i32, %c0_i32_0 : i32, i32
  }
  func.func @transform_9(%arg0: i32, %arg1: i32) -> (i32, i32) {
    %c0_i32 = arith.constant 0 : i32
    %c0_i32_0 = arith.constant 0 : i32
    %c0_i32_1 = arith.constant 0 : i32
    return %c0_i32, %c0_i32_0 : i32, i32
  }
  func.func @transform_10(%arg0: i32, %arg1: i32) -> (i32, i32) {
    %c0_i32 = arith.constant 0 : i32
    %c0_i32_0 = arith.constant 0 : i32
    %c0_i32_1 = arith.constant 0 : i32
    return %c0_i32, %c0_i32_0 : i32, i32
  }
  func.func @transform_11(%arg0: i32, %arg1: i32) -> (i32, i32) {
    %c0_i32 = arith.constant 0 : i32
    %c0_i32_0 = arith.constant 0 : i32
    %c0_i32_1 = arith.constant 0 : i32
    return %c0_i32, %c0_i32_0 : i32, i32
  }
  func.func @transform_12(%arg0: i32, %arg1: i32) -> (i32, i32) {
    %c0_i32 = arith.constant 0 : i32
    %c0_i32_0 = arith.constant 0 : i32
    %c0_i32_1 = arith.constant 0 : i32
    return %c0_i32, %c0_i32_0 : i32, i32
  }
  func.func @transform_13(%arg0: i32, %arg1: i32) -> (i32, i32) {
    %c0_i32 = arith.constant 0 : i32
    %c0_i32_0 = arith.constant 0 : i32
    %c0_i32_1 = arith.constant 0 : i32
    return %c0_i32, %c0_i32_0 : i32, i32
  }
  func.func @transform_14(%arg0: i32, %arg1: i32) -> (i32, i32) {
    %c0_i32 = arith.constant 0 : i32
    %c0_i32_0 = arith.constant 0 : i32
    %c0_i32_1 = arith.constant 0 : i32
    return %c0_i32, %c0_i32_0 : i32, i32
  }
  func.func @transform_15(%arg0: i32, %arg1: i32) -> (i32, i32, i32) {
    %c0_i32 = arith.constant 0 : i32
    %c0_i32_0 = arith.constant 0 : i32
    %c0_i32_1 = arith.constant 0 : i32
    return %arg0, %c0_i32, %c0_i32_0 : i32, i32, i32
  }
}

</mosaic_0001>

<bundles_post_ra>
// kernel: tpu_custom_call.1
= control target key start
LH: loop header
LB: loop body
LE: loop exit
PB: predicated region body
PF: predicated region fallthrough
CT: control target
= control target key end

     0   :  { %s1902_s0 = inlined_call_operand.hbm [shape: f32[2,8,32], index: 0, kind: input, shape index: {}, may-alias: {0,15}]   ;;  %s1903_s1 = inlined_call_operand.vmem [shape: bf16[32,96], index: 1, kind: input, shape index: {}]   ;;  %s1904_s2 = inlined_call_operand.vmem [shape: f32[1,96], index: 2, kind: input, shape index: {}]   ;;  %s1905_s3 = inlined_call_operand.vmem [shape: bf16[32,32], index: 3, kind: input, shape index: {}]   ;;  %s1906_s4 = inlined_call_operand.vmem [shape: f32[1,32], index: 4, kind: input, shape index: {}]   ;;  %s1907_s5 = inlined_call_operand.vmem [shape: bf16[32,64], index: 5, kind: input, shape index: {}]   ;;  %s1908_s6 = inlined_call_operand.vmem [shape: f32[1,64], index: 6, kind: input, shape index: {}]   ;;  %s1909_s7 = inlined_call_operand.vmem [shape: bf16[64,32], index: 7, kind: input, shape index: {}]   ;;  %s1910_s8 = inlined_call_operand.vmem [shape: f32[1,32], index: 8, kind: input, shape index: {}]   ;;  %s1911_s9 = inlined_call_operand.vmem [shape: f32[1,32], index: 9, kind: input, shape index: {}]   ;;  %s1912_s10 = inlined_call_operand.vmem [shape: f32[1,32], index: 10, kind: input, shape index: {}]   ;;  %s1913_s11 = inlined_call_operand.vmem [shape: f32[1,32], index: 11, kind: input, shape index: {}]   ;;  %s1914_s12 = inlined_call_operand.vmem [shape: f32[1,32], index: 12, kind: input, shape index: {}]   ;;  %s1915_s13 = inlined_call_operand.vmem [shape: f32[1,32], index: 13, kind: input, shape index: {}]   ;;  %s1916_s14 = inlined_call_operand.vmem [shape: f32[1,32], index: 14, kind: input, shape index: {}]   ;;  %s1917_s15 = inlined_call_operand.hbm [shape: f32[2,8,32], index: 15, kind: output, shape index: {}, may-alias: {0,15}]  }
   0x1   :  { %1928 = sst [smem:[#allocation20_spill]] %s1902_s0 }
   0x2   :  { %1929 = sst [smem:[#allocation21_spill]] %s1903_s1 }
   0x3   :  { %1930 = sst [smem:[#allocation22_spill]] %s1904_s2 }
   0x4   :  { %1931 = sst [smem:[#allocation23_spill]] %s1915_s13 }
   0x5   :  { %1932 = sst [smem:[#allocation24_spill]] %s1916_s14 }
   0x6   :  { %1933 = sst [smem:[#allocation25_spill]] %s1917_s15 }
   0x7   :  { %20 = vsyncpa [#allocation8], 0 }
   0x8   :  { %21 = vsyncpa [#allocation9], 0 }
   0x9   :  { %23 = vsyncpa [#allocation9 + $0x1], 0  ;;  %s1607_s18 = smov 0   ;;  %s1609_s19 = smov 0  }
   0xa   :  { %1934 = sst [smem:[#allocation13_spill]] %s1607_s18  ;;  %s1611_s20 = smov 0  }
   0xb   :  { %s1613_s21 = smov 0   ;;  %s1615_s22 = smov 0  }
   0xc   :  { %s1617_s23 = smov 0   ;;  %s1619_s24 = smov 0  }
   0xd   :  { %s1621_s25 = smov 0  }
   0xe LB: > { %s1936_s18 = sld [smem:[#allocation13_spill]]  ;;  %s1180_s26 = sadd.s32 4294967295, %s1509_s25   ;;  %s1509_s25 = sphi %s1621_s25, %s29_s25   ;;  %s1505_s24 = sphi %s1619_s24, %s1964_s24   ;;  %s1501_s23 = sphi %s1617_s23, %s1963_s23   ;;  %s1497_s22 = sphi %s1615_s22, %s1962_s22   ;;  %s1493_s21 = sphi %s1613_s21, %s1961_s21   ;;  %s1489_s20 = sphi %s1611_s20, %s1967_s20   ;;  %s1485_s19 = sphi %s1609_s19, %s1966_s19  }
   0xf   : > { %1938 = sst [smem:[#allocation14_spill]] %s1501_s23  ;;  %s1181_s27 = sadd.s32 4294967294, %s1509_s25  }
  0x10   : > { %1939 = sst [smem:[#allocation15_spill]] %s1505_s24  ;;  %s38_s28 = sadd.s32 1, %s1501_s23 }
  0x11   : > { %s41_s29 = sadd.s32 1, %s1505_s24  ;;  %p39_p0 = scmp.ge.s32.totalorder %s38_s28, 2 }
  0x12   : > { %s48_s30 = sadd.s32 1, %s1489_s20  ;;  %p62_p2 = scmp.eq.s32.totalorder %s1180_s26, 0 }
  0x13   : > { %s1969_s28 = smov (%p39_p0, %s38_s28), 0  ;;  %s1971_s29 = smov (!%p39_p0, %s41_s29), %s1505_s24 }
  0x14   : > { %1937 = sst [smem:[#allocation13_spill]] %s1936_s18  ;;  %p61_p1 = scmp.ne.s32.totalorder %s1485_s19, %s1936_s18 }
  0x15   : > { %1940 = sst [smem:[#allocation16_spill]] %s1969_s28  ;;  %p378_p4 = scmp.ne.s32.totalorder %s1489_s20, %s1485_s19 }
  0x16   : > { %p1657_p3 = por %p62_p2, %p61_p1  ;;  %p43_p5 = scmp.ge.s32.totalorder %s1971_s29, 2 }
  0x17   : > { %p379_p6 = scmp.eq.s32.totalorder %s1180_s26, 3  ;;  %p385_p7 = scmp.eq.s32.totalorder %s1181_s27, 3 }
  0x18   : > { %p1182_p8 = scmp.ge.s32.totalorder %s1509_s25, 1  ;;  %s1973_s29 = smov (%p43_p5, %s1971_s29), 0 }
  0x19   : > { %1942 = sst [smem:[#allocation17_spill]] %s1973_s29  ;;  %p1666_p9 = por %p379_p6, %p378_p4 }
  0x1a   : > { %p1670_p10 = por %p385_p7, %p61_p1  ;;  %s45_s23 = ssub.s32 %s1505_s24, %s1973_s29 }
  0x1b   : > { %s1943_s17 = scalar_select %p1666_p9, 1, 0 }
  0x1c   : > { %s1945_s28 = scalar_select %p1670_p10, 1, 0 }
  0x1d   : > { %1944 = sst [smem:[#allocation18_spill]] %s1943_s17  ;;  %p392_p11 = scmp.lt.s32.totalorder %s1509_s25, 5 }
  0x1e   : > { %1946 = sst [smem:[#allocation19_spill]] %s1945_s28  ;;  %p46_p12 = scmp.eq.s32.totalorder %s45_s23, 0 }
  0x1f   : > { %s1926_s18 = sshll.u32 %s1497_s22, 3  ;;  %p1678_p13 = pnand %p1182_p8, %p392_p11 }
  0x20   : > { %s1948_s0 = sld [smem:[#allocation20_spill]]  ;;  %s1511_s29 = smov [#allocation7]  }
  0x21   : > { %s1688_s13 = scalar_select %p46_p12, %s1489_s20, %s48_s30  }
  0x22   : > { %p1258_p0 = pneg %p1678_p13  ;;  %s408_s24 = sshll.u32 %s1511_s29, 4  ;;  %s409_s24 = int_to_ptr.vmem [resolvable:$true] %s408_s24 }
  0x24   : > { %p1694_p1 = pnand %p1258_p0, %p1657_p3 }
  0x26   : > { %s404_s14 = scalar_lea.hbm %s1948_s0, %s1926_s18  ;;  %p1385_p4 = pneg %p1694_p1 }
  0x27   : > { %s406_s17 = sshll.u32 %s404_s14, 4  ;;  %s1388_s27 = scalar_lea.hbm %s1948_s0, 16  ;;  %s407_s17 = int_to_ptr.hbm [resolvable:$true] %s406_s17 }
  0x28   : > { %s1381_s28 = sshra.s32 %s407_s17, 4  ;;  %s1382_s28 = int_to_ptr.hbm [resolvable:$true] %s1381_s28 }
  0x29   : > { %s1383_s15 = scalar_lea.hbm %s1382_s28, 8  ;;  %p1389_p7 = scmp.lt.s32.totalorder %s1382_s28, %s1948_s0 }
  0x2a   : > { %p1384_p2 = scmp.ne.s32.totalorder %s1382_s28, %s1383_s15  ;;  %p1390_p8 = scmp.lt.s32.totalorder %s1388_s27, %s1383_s15 }
  0x2c   : > { %p1386_p5 = pnand %p1385_p4, %p1384_p2  ;;  %p1391_p11 = por %p1390_p8, %p1389_p7 }
  0x2e   : > { %p1387_p6 = pneg %p1386_p5 }
  0x30   : > { %p1392_p12 = pnand %p1391_p11, %p1387_p6 }
  0x32   : > { %1395 = shalt.err (!%p1392_p12)
}
  0x33   : > { %1261 = dma.hbm_to_vmem [thread:$0]  (!%p1694_p1), %s407_s17, 128, %s409_s24, [#allocation8]  }
  0x34   : > { %463 = sbr.rel (%p1678_p13) target bundleno = 2218 (0x8aa), region = 80 }
  0x39   : > { %1472 = dma.done.wait (%p1657_p3), [#allocation8], 128  }
  0x3a   : > { %1474 = vsyncadd (%p1657_p3), [#allocation8], 4294967168  ;;  %s1927_s18 = sand.u32 1, %s1485_s19   ;;  %p1186_p0 = scmp.ne.s32.totalorder %s1493_s21, 0 }
  0x3b   : > { %s1717_s28 = sshll.u32 %s1927_s18, 3 }
  0x3c   : > { %s506_s15 = scalar_lea.vmem [#allocation10], %s1717_s28  ;;  %511 = sbr.rel (%p1186_p0) target bundleno = 67 (0x43), region = 88 }
  0x41   : > { %v512_v0 = vld [vmem:[#allocation7] sm:$0xff]  ;;  %vm513_vm0 = vcmask 261120  }
  0x42   : > { %514 = vst.msk [vmem:[#allocation2] sm:$0xff] %vm513_vm0, %v512_v0 }
  0x43 PF: > { %s1950_s1 = sld [smem:[#allocation21_spill]]  ;;  %vm537_vm1 = vcmask 261120   ;;  %vm556_vm2 = vcmask 60416   ;;  %s1512_s14 = smov 72   ;;  %vm626_vm3 = vcmask 64512   ;;  %vm754_vm4 = vcmask 1043456  }
  0x44   : > { %s1951_s2 = sld [smem:[#allocation22_spill]]  ;;  %s1513_s27 = smov 88   ;;  %vm835_vm5 = vcmask 126016   ;;  %vm842_vm6 = vcmask 191616   ;;  %vm849_vm7 = vcmask 257216   ;;  %vm1003_vm12 = vcmask 523264  }
  0x45   : > { %s1514_s29 = smov 120   ;;  %s1515_s24 = smov 80  }
  0x46   : > { %s1516_s17 = smov 104   ;;  %s1517_s16 = smov 112  }
  0x47   : > { %s1518_s26 = smov 96   ;;  %s1519_s23 = smov 48  }
  0x48   : > { %s1520_s30 = smov 64   ;;  %p1239_p3 = scmp.ne.s32.totalorder %s1493_s21, 1 }
  0x49   : > { %v1245_v1 = vld [vmem:[%s1950_s1 + $0x8] sm:$0xff]  ;;  %v1244_v2 = vld [vmem:[%s1950_s1] sm:$0xff] }
  0x4a   : > { %v1727_v3 = vld [vmem:[#allocation2] sm:$0xff]  ;;  %547 = vmatpush.bf16.msra.mxu0 %v1245_v1 }
  0x4b   : > { %v516_v4 = vpack.c.bf16 %v1727_v3, %v1727_v3  ;;  %v1347_v5 = vld [vmem:[%s1951_s2] ss:$0 sm:$0xff] }
  0x4e   : > { %548 = vmatpush.bf16.msra.mxu0 %v1244_v2 }
  0x51   : > { %1195 = vmatmul.msk.bf16.vlgmr.msra.gmra.mxu0 %vm537_vm1, %v516_v4 }
  0xce   : > { %v550_v6 = vpop.f32.mrf.mxu0 }
  0xcf   : > { %v551_v7 = vadd.f32 %v1347_v5, %v550_v6 }
  0xd1   : > { %v554_v8 = vmul.f32 0.35355338, %v551_v7  ;;  %v1735_v9 = vpack.c.bf16 %v551_v7, %v551_v7 }
  0xd3   : > { %v555_v10 = vpack.c.bf16 %v554_v8, %v554_v8  ;;  %604 = vrot.lane.b32.xlu2 %v1735_v9, %s1512_s14  ;;  %574 = vrot.lane.b32.xlu0 %v1735_v9, %s1513_s27  ;;  %s1521_s14 = smov 56   ;;  %s1522_s27 = smov 40  }
  0xd5   : > { %557 = vst.msk [vmem:[#allocation3] sm:$0xf] %vm556_vm2, %v555_v10  ;;  %569 = vrot.lane.b32.xlu1 %v555_v10, %s1514_s29  ;;  %s1523_s29 = smov 8  }
  0xd6   : > { %v552_v11 = vpop.f32.mrf.mxu0 }
  0xdb   : > { %589 = vrot.lane.b32.xlu0 %v1735_v9, %s1515_s24  ;;  %599 = vrot.lane.b32.xlu2 %v555_v10, %s1516_s17  ;;  %s1524_s24 = smov 16   ;;  %s1525_s17 = smov 24  }
  0xdc   : > { %v614_v30 = vld [vmem:[#allocation3] sm:$0xf] }
  0xdd   : > { %584 = vrot.lane.b32.xlu1 %v555_v10, %s1517_s16 }
  0xe3   : > { %560 = vrot.lane.b32.xlu0 %v1735_v9, %s1518_s26 }
 0x12d   : > { %v605_v12 = vpop.permute.xlu2 %604 }
 0x12e   : > { %608 = vst.msk [vmem:[#allocation4 + $0xc] sm:$0xf] %vm556_vm2, %v605_v12 }
 0x135   : > { %v600_v13 = vpop.permute.xlu2 %599  ;;  %v621_v14 = vld [vmem:[#allocation4 + $0xc] sm:$0xf] }
 0x136   : > { %603 = vst.msk [vmem:[#allocation3 + $0xc] sm:$0xf] %vm556_vm2, %v600_v13  ;;  %v688_v15 = vsel %vm626_vm3, %v621_v14, 0 }
 0x137   : > { %697 = vmatpush.bf16.xpose.msrb.mxu0 %v688_v15 }
 0x13d   : > { %v617_v16 = vld [vmem:[#allocation3 + $0xc] sm:$0xf] }
 0x13e   : > { %1199 = vmatmul.msk.bf16.vlgmr.msrb.gmra.mxu0 %vm626_vm3, %v617_v16 }
 0x145   : > { %v575_v17 = vpop.permute.xlu0 %574 }
 0x146   : > { %578 = vst.msk [vmem:[#allocation4 + $0x4] sm:$0xf] %vm556_vm2, %v575_v17 }
 0x147   : > { %v570_v18 = vpop.permute.xlu1 %569 }
 0x148   : > { %573 = vst.msk [vmem:[#allocation3 + $0x4] sm:$0xf] %vm556_vm2, %v570_v18 }
 0x14d   : > { %v590_v19 = vpop.permute.xlu0 %589  ;;  %v619_v20 = vld [vmem:[#allocation4 + $0x4] sm:$0xf] }
 0x14e   : > { %593 = vst.msk [vmem:[#allocation4 + $0x8] sm:$0xf] %vm556_vm2, %v590_v19  ;;  %v650_v21 = vsel %vm626_vm3, %v619_v20, 0 }
 0x14f   : > { %659 = vmatpush.bf16.xpose.msra.mxu2 %v650_v21  ;;  %v585_v22 = vpop.permute.xlu1 %584  ;;  %v615_v24 = vld [vmem:[#allocation3 + $0x4] sm:$0xf] }
 0x150   : > { %588 = vst.msk [vmem:[#allocation3 + $0x8] sm:$0xf] %vm556_vm2, %v585_v22 }
 0x155   : > { %v561_v23 = vpop.permute.xlu0 %560  ;;  %v620_v25 = vld [vmem:[#allocation4 + $0x8] sm:$0xf] }
 0x156   : > { %563 = vst.msk [vmem:[#allocation4] sm:$0xf] %vm556_vm2, %v561_v23  ;;  %1197 = vmatmul.msk.bf16.vlgmr.msra.gmra.mxu2 %vm626_vm3, %v615_v24  ;;  %v669_v26 = vsel %vm626_vm3, %v620_v25, 0 }
 0x157   : > { %678 = vmatpush.bf16.xpose.msra.mxu3 %v669_v26  ;;  %v616_v27 = vld [vmem:[#allocation3 + $0x8] sm:$0xf] }
 0x15d   : > { %v618_v28 = vld [vmem:[#allocation4] sm:$0xf] }
 0x15e   : > { %1198 = vmatmul.msk.bf16.vlgmr.msra.gmra.mxu3 %vm626_vm3, %v616_v27  ;;  %v631_v29 = vsel %vm626_vm3, %v618_v28, 0 }
 0x15f   : > { %640 = vmatpush.bf16.xpose.msra.mxu1 %v631_v29 }
 0x166   : > { %1196 = vmatmul.msk.bf16.vlgmr.msra.gmra.mxu1 %vm626_vm3, %v614_v30 }
 0x1bb   : > { %v699_v31 = vpop.f32.mrf.mxu0 }
 0x1bc   : > { %v712_v32 = vsel %vm626_vm3, %v699_v31, -inf }
 0x1bd   : > { %713 = vmax.xlane.f32.xlu0 %v712_v32 }
 0x1c3   : > { %v701_v33 = vpop.f32.mrf.mxu0 }
 0x1d1   : > { %594 = vrot.lane.b32.xlu0 %v1735_v9, %s1519_s23 }
 0x1d9   : > { %564 = vrot.lane.b32.xlu0 %v1735_v9, %s1520_s30  ;;  %v661_v34 = vpop.f32.mrf.mxu2 }
 0x1da   : > { %v706_v35 = vsel %vm626_vm3, %v661_v34, -inf }
 0x1db   : > { %707 = vmax.xlane.f32.xlu1 %v706_v35 }
 0x1e1   : > { %v663_v36 = vpop.f32.mrf.mxu2  ;;  %v680_v37 = vpop.f32.mrf.mxu3 }
 0x1e2   : > { %v709_v38 = vsel %vm626_vm3, %v680_v37, -inf }
 0x1e3   : > { %710 = vmax.xlane.f32.xlu2 %v709_v38  ;;  %v642_v39 = vpop.f32.mrf.mxu1 }
 0x1e4   : > { %v703_v41 = vsel %vm626_vm3, %v642_v39, -inf }
 0x1e9   : > { %v682_v40 = vpop.f32.mrf.mxu3 }
 0x1ea   : > { %v1247_v40 = vld [vmem:[%s1905_s3 + $0x8] sm:$0xff] }
 0x1eb   : > { %704 = vmax.xlane.f32.xlu2 %v703_v41  ;;  %v644_v42 = vpop.f32.mrf.mxu1  ;;  %v1246_v41 = vld [vmem:[%s1905_s3] sm:$0xff] }
 0x1f4   : > { %579 = vrot.lane.b32.xlu1 %v1735_v9, %s1521_s14  ;;  %s1952_s14 = sld [smem:[#allocation23_spill]] (!%p1239_p3) }
 0x230   : > { %v714_v43 = vpop.xlane.xlu0 %713 }
 0x231   : > { %v718_v44 = vsub.f32 %v699_v31, %v714_v43 }
 0x233   : > { %v725_v45 = vmul.f32 1.442695, %v718_v44 }
 0x235   : > { %1355 = vpow2.f32 %v725_v45 }
 0x23b   : > { %v1356_v46 = vpop.eup %1355 }
 0x23c   : > { %v736_v47 = vsel %vm626_vm3, %v1356_v46, 0.0 }
 0x23d   : > { %737 = vadd.xlane.f32.xlu1 %v736_v47 }
 0x243   : > { %v595_v48 = vpop.permute.xlu0 %594 }
 0x244   : > { %598 = vst.msk [vmem:[#allocation5 + $0x8] sm:$0xf] %vm556_vm2, %v595_v48 }
 0x24b   : > { %v565_v49 = vpop.permute.xlu0 %564  ;;  %v624_v50 = vld [vmem:[#allocation5 + $0x8] sm:$0xf] }
 0x24c   : > { %567 = vst.msk [vmem:[#allocation5] sm:$0xf] %vm556_vm2, %v565_v49  ;;  %v794_v51 = vsel %vm754_vm4, %v624_v50, 0 }
 0x24d   : > { %803 = vmatpush.bf16.msrb.mxu3 %v794_v51 }
 0x24e   : > { %v708_v52 = vpop.xlane.xlu1 %707 }
 0x24f   : > { %v716_v53 = vsub.f32 %v661_v34, %v708_v52  ;;  %v1526_v52 = vmov 32.0  }
 0x251   : > { %v721_v54 = vmul.f32 1.442695, %v716_v53 }
 0x253   : > { %1357 = vpow2.f32 %v721_v54  ;;  %v622_v55 = vld [vmem:[#allocation5] sm:$0xf] }
 0x254   : > { %v756_v56 = vsel %vm754_vm4, %v622_v55, 0 }
 0x255   : > { %765 = vmatpush.bf16.msrb.mxu1 %v756_v56 }
 0x256   : > { %v711_v57 = vpop.xlane.xlu2 %710 }
 0x257   : > { %v717_v58 = vsub.f32 %v680_v37, %v711_v57 }
 0x259   : > { %v1358_v59 = vpop.eup %1357  ;;  %v723_v60 = vmul.f32 1.442695, %v717_v58  ;;  %881 = vmatpush.bf16.msra.mxu1 %v1247_v40 }
 0x25a   : > { %v730_v61 = vsel %vm626_vm3, %v1358_v59, 0.0 }
 0x25b   : > { %1359 = vpow2.f32 %v723_v60  ;;  %731 = vadd.xlane.f32.xlu2 %v730_v61 }
 0x25d   : > { %882 = vmatpush.bf16.msra.mxu1 %v1246_v41 }
 0x25e   : > { %v705_v62 = vpop.xlane.xlu2 %704 }
 0x25f   : > { %v715_v63 = vsub.f32 %v642_v39, %v705_v62 }
 0x261   : > { %v1360_v0 = vpop.eup %1359  ;;  %v719_v1 = vmul.f32 1.442695, %v715_v63  ;;  %v1249_v63 = vld [vmem:[%s1907_s5 + $0x8] sm:$0xff] }
 0x262   : > { %v733_v2 = vsel %vm626_vm3, %v1360_v0, 0.0 }
 0x263   : > { %1361 = vpow2.f32 %v719_v1  ;;  %734 = vadd.xlane.f32.xlu2 %v733_v2  ;;  %v1253_v1 = vld [vmem:[%s1909_s7 + $0x18] sm:$0xff] }
 0x264   : > { %1011 = vmatpush.bf16.msra.mxu3 %v1253_v1 }
 0x266   : > { %v580_v4 = vpop.permute.xlu1 %579 }
 0x267   : > { %583 = vst.msk [vmem:[#allocation5 + $0x4] sm:$0xf] %vm556_vm2, %v580_v4 }
 0x269   : > { %v1362_v5 = vpop.eup %1361 }
 0x26a   : > { %v727_v6 = vsel %vm626_vm3, %v1362_v5, 0.0 }
 0x26b   : > { %728 = vadd.xlane.f32.xlu0 %v727_v6 }
 0x26e   : > { %v623_v7 = vld [vmem:[#allocation5 + $0x4] sm:$0xf] }
 0x26f   : > { %v775_v8 = vsel %vm754_vm4, %v623_v7, 0 }
 0x270   : > { %784 = vmatpush.bf16.msrb.mxu2 %v775_v8 }
 0x274   : > { %958 = vmatpush.bf16.msra.mxu2 %v1249_v63 }
 0x27b   : > { %609 = vrot.lane.b32.xlu2 %v1735_v9, %s1522_s27 }
 0x2b0   : > { %v738_v15 = vpop.xlane.xlu1 %737 }
 0x2ce   : > { %v732_v10 = vpop.xlane.xlu2 %731 }
 0x2cf   : > { %1363 = vrcp.f32 %v732_v10 }
 0x2d5   : > { %v1364_v11 = vpop.eup %1363 }
 0x2d6   : > { %v744_v12 = vmul.f32 %v1364_v11, %v1358_v59  ;;  %v735_v13 = vpop.xlane.xlu2 %734 }
 0x2d7   : > { %1365 = vrcp.f32 %v735_v13 }
 0x2d8   : > { %v748_v14 = vpack.c.bf16 %v744_v12, %v744_v12  ;;  %1367 = vrcp.f32 %v738_v15 }
 0x2da   : > { %1201 = vmatmul.msk.bf16.vlgmr.msrb.gmra.mxu2 %vm626_vm3, %v748_v14  ;;  %v1349_v14 = vld [vmem:[%s1911_s9] ss:$0 sm:$0xff] }
 0x2dd   : > { %v1366_v16 = vpop.eup %1365 }
 0x2de   : > { %v745_v17 = vmul.f32 %v1366_v16, %v1360_v0  ;;  %v729_v18 = vpop.xlane.xlu0 %728  ;;  %v610_v19 = vpop.permute.xlu2 %609  ;;  %v1248_v0 = vld [vmem:[%s1907_s5] sm:$0xff] }
 0x2df   : > { %1369 = vrcp.f32 %v729_v18  ;;  %613 = vst.msk [vmem:[#allocation5 + $0xc] sm:$0xf] %vm556_vm2, %v610_v19  ;;  %v1368_v9 = vpop.eup %1367  ;;  %959 = vmatpush.bf16.msra.mxu2 %v1248_v0  ;;  %v1350_v16 = vld [vmem:[%s1912_s10] ss:$0 sm:$0xff] }
 0x2e0   : > { %v749_v20 = vpack.c.bf16 %v745_v17, %v745_v17  ;;  %v746_v22 = vmul.f32 %v1368_v9, %v1356_v46  ;;  %v1348_v46 = vld [vmem:[%s1906_s4] ss:$0 sm:$0xff]  ;;  %1371 = vrcp.f32 %v1526_v52  ;;  %v1251_v9 = vld [vmem:[%s1909_s7 + $0x8] sm:$0xff] }
 0x2e2   : > { %1202 = vmatmul.msk.bf16.vlgmr.msrb.gmra.mxu3 %vm626_vm3, %v749_v20  ;;  %v750_v27 = vpack.c.bf16 %v746_v22, %v746_v22  ;;  %v1351_v22 = vld [vmem:[%s1908_s6] ss:$0 sm:$0xff] }
 0x2e5   : > { %v1370_v21 = vpop.eup %1369 }
 0x2e6   : > { %v743_v23 = vmul.f32 %v1370_v21, %v1362_v5  ;;  %v625_v24 = vld [vmem:[#allocation5 + $0xc] sm:$0xf]  ;;  %v1372_v53 = vpop.eup %1371  ;;  %v1250_v21 = vld [vmem:[%s1909_s7] sm:$0xff] }
 0x2e7   : > { %v813_v25 = vsel %vm754_vm4, %v625_v24, 0  ;;  %v895_v54 = vmul.f32 32.0, %v1372_v53  ;;  %vm899_vm8 = vweird.f32 %v1372_v53  ;;  %v1252_v5 = vld [vmem:[%s1909_s7 + $0x10] sm:$0xff] }
 0x2e8   : > { %822 = vmatpush.bf16.msra.mxu0 %v813_v25  ;;  %v747_v26 = vpack.c.bf16 %v743_v23, %v743_v23  ;;  %1012 = vmatpush.bf16.msra.mxu3 %v1252_v5 }
 0x2e9   : > { %v896_v55 = vsub.f32 1.0, %v895_v54 }
 0x2ea   : > { %1200 = vmatmul.msk.bf16.vlgmr.msrb.gmra.mxu1 %vm626_vm3, %v747_v26 }
 0x2eb   : > { %1203 = vmatmul.msk.bf16.vlgmr.msra.gmra.mxu0 %vm626_vm3, %v750_v27  ;;  %v897_v56 = vmul.f32 %v1372_v53, %v896_v55 }
 0x2ec   : > { %1013 = vmatpush.bf16.msra.mxu3 %v1251_v9 }
 0x2ed   : > { %v898_v57 = vadd.f32 %v1372_v53, %v897_v56 }
 0x2ef   : > { %v1794_v58 = vsel %vm899_vm8, %v1372_v53, %v898_v57 }
 0x2f0   : > { %1014 = vmatpush.bf16.msra.mxu3 %v1250_v21 }
 0x35d   : > { %v786_v28 = vpop.f32.mrf.mxu2 }
 0x35e   : > { %v830_v29 = vpack.c.bf16 %v786_v28, %v786_v28  ;;  %v1352_v28 = vld [vmem:[%s1910_s8] ss:$0 sm:$0xff] }
 0x360   : > { %832 = vrot.lane.b32.xlu2 %v830_v29, %s1523_s29 }
 0x365   : > { %v788_v30 = vpop.f32.mrf.mxu2  ;;  %v805_v31 = vpop.f32.mrf.mxu3 }
 0x366   : > { %v837_v32 = vpack.c.bf16 %v805_v31, %v805_v31 }
 0x367   : > { %v767_v33 = vpop.f32.mrf.mxu1 }
 0x368   : > { %v828_v34 = vpack.c.bf16 %v767_v33, %v767_v33  ;;  %839 = vrot.lane.b32.xlu2 %v837_v32, %s1524_s24  ;;  %v824_v35 = vpop.f32.mrf.mxu0  ;;  %s1953_s24 = sld [smem:[#allocation24_spill]] (!%p1239_p3) }
 0x369   : > { %v844_v37 = vpack.c.bf16 %v824_v35, %v824_v35 }
 0x36a   : > { %829 = vst.msk [vmem:[#allocation6] sm:$0xf] %vm556_vm2, %v828_v34 }
 0x36d   : > { %v807_v36 = vpop.f32.mrf.mxu3 }
 0x36f   : > { %v769_v38 = vpop.f32.mrf.mxu1 }
 0x370   : > { %846 = vrot.lane.b32.xlu2 %v844_v37, %s1525_s17  ;;  %v826_v39 = vpop.f32.mrf.mxu0 }
 0x3ba   : > { %v833_v42 = vpop.permute.xlu2 %832 }
 0x3bb   : > { %836 = vst.msk [vmem:[#allocation6] sm:$0xf] %vm835_vm5, %v833_v42 }
 0x3c2   : > { %v840_v43 = vpop.permute.xlu2 %839 }
 0x3c3   : > { %843 = vst.msk [vmem:[#allocation6] sm:$0xf] %vm842_vm6, %v840_v43 }
 0x3ca   : > { %v847_v44 = vpop.permute.xlu2 %846 }
 0x3cb   : > { %850 = vst.msk [vmem:[#allocation6] sm:$0xf] %vm849_vm7, %v847_v44 }
 0x3d2   : > { %v851_v45 = vld [vmem:[#allocation6] sm:$0xf] }
 0x3d3   : > { %1212 = vmatmul.msk.bf16.vlgmr.msra.gmra.mxu1 %vm537_vm1, %v851_v45 }
 0x450   : > { %v884_v47 = vpop.f32.mrf.mxu1 }
 0x451   : > { %v885_v48 = vadd.f32 %v1348_v46, %v884_v47 }
 0x453   : > { %v888_v49 = vadd.f32 %v885_v48, %v1727_v3  ;;  %v1353_v48 = vld [vmem:[%s1913_s11] ss:$0 sm:$0xff] }
 0x455   : > { %v891_v50 = vsel %vm537_vm1, %v888_v49, 0.0 }
 0x456   : > { %892 = vadd.xlane.f32.xlu1 %v891_v50  ;;  %v1354_v50 = vld [vmem:[%s1914_s12] ss:$0 sm:$0xff] }
 0x458   : > { %v886_v51 = vpop.f32.mrf.mxu1 }
 0x4c9   : > { %v893_v59 = vpop.xlane.xlu1 %892 }
 0x4ca   : > { %v901_v60 = vmul.f32 %v1794_v58, %v893_v59 }
 0x4cc   : > { %v902_v61 = vsub.f32 %v888_v49, %v901_v60 }
 0x4ce   : > { %v903_v62 = vmul.f32 %v902_v61, %v902_v61 }
 0x4d0   : > { %v904_v3 = vsel %vm537_vm1, %v903_v62, 0.0 }
 0x4d1   : > { %905 = vadd.xlane.f32.xlu2 %v904_v3 }
 0x544   : > { %v906_v2 = vpop.xlane.xlu2 %905 }
 0x545   : > { %v907_v4 = vmul.f32 %v906_v2, %v1794_v58 }
 0x547   : > { %v908_v6 = vadd.f32 1e-05, %v907_v4 }
 0x549   : > { %1373 = vrsqrt.f32 %v908_v6  ;;  %vm915_vm10 = vweird.f32 %v908_v6 }
 0x54f   : > { %v1374_v7 = vpop.eup %1373 }
 0x550   : > { %v910_v8 = vmul.f32 %v1374_v7, %v908_v6  ;;  %vm916_vm9 = vweird.f32 %v1374_v7 }
 0x551   : > { %vm917_vm11 = vmor %vm915_vm10, %vm916_vm9 }
 0x552   : > { %v911_v10 = vmul.f32 %v1374_v7, %v910_v8 }
 0x554   : > { %v912_v11 = vmul.f32 0.5, %v911_v10 }
 0x556   : > { %v913_v12 = vsub.f32 1.5, %v912_v11 }
 0x558   : > { %v914_v13 = vmul.f32 %v1374_v7, %v913_v12 }
 0x55a   : > { %v918_v15 = vsel %vm917_vm11, %v1374_v7, %v914_v13 }
 0x55b   : > { %v919_v17 = vmul.f32 %v918_v15, %v902_v61 }
 0x55d   : > { %v923_v18 = vmul.f32 %v1349_v14, %v919_v17 }
 0x55f   : > { %v927_v19 = vadd.f32 %v1350_v16, %v923_v18 }
 0x561   : > { %v928_v20 = vpack.c.bf16 %v927_v19, %v927_v19 }
 0x563   : > { %1221 = vmatmul.msk.bf16.vlgmr.msra.gmra.mxu2 %vm537_vm1, %v928_v20 }
 0x5e6   : > { %v961_v23 = vpop.f32.mrf.mxu2 }
 0x5e7   : > { %v962_v24 = vadd.f32 %v1351_v22, %v961_v23 }
 0x5e9   : > { %v965_v25 = vmax.f32 %v962_v24, 0.0 }
 0x5eb   : > { %v966_v26 = vpack.c.bf16 %v965_v25, %v965_v25 }
 0x5ed   : > { %1238 = vmatmul.msk.bf16.vlgmr.msra.gmra.mxu3 %vm1003_vm12, %v966_v26 }
 0x5ee   : > { %v963_v27 = vpop.f32.mrf.mxu2 }
 0x670   : > { %v1016_v29 = vpop.f32.mrf.mxu3 }
 0x671   : > { %v1017_v30 = vadd.f32 %v1352_v28, %v1016_v29 }
 0x673   : > { %v1020_v31 = vadd.f32 %v1017_v30, %v927_v19 }
 0x675   : > { %v1023_v32 = vsel %vm537_vm1, %v1020_v31, 0.0 }
 0x676   : > { %1024 = vadd.xlane.f32.xlu1 %v1023_v32 }
 0x678   : > { %v1018_v33 = vpop.f32.mrf.mxu3 }
 0x6e9   : > { %v1025_v34 = vpop.xlane.xlu1 %1024 }
 0x6ea   : > { %v1026_v35 = vmul.f32 %v1025_v34, %v1794_v58 }
 0x6ec   : > { %v1027_v36 = vsub.f32 %v1020_v31, %v1026_v35 }
 0x6ee   : > { %v1028_v37 = vmul.f32 %v1027_v36, %v1027_v36 }
 0x6f0   : > { %v1029_v38 = vsel %vm537_vm1, %v1028_v37, 0.0 }
 0x6f1   : > { %1030 = vadd.xlane.f32.xlu0 %v1029_v38 }
 0x764   : > { %v1031_v39 = vpop.xlane.xlu0 %1030 }
 0x765   : > { %v1032_v40 = vmul.f32 %v1031_v39, %v1794_v58 }
 0x767   : > { %v1033_v41 = vadd.f32 1e-05, %v1032_v40 }
 0x769   : > { %1375 = vrsqrt.f32 %v1033_v41  ;;  %vm1040_vm14 = vweird.f32 %v1033_v41 }
 0x76f   : > { %v1376_v42 = vpop.eup %1375 }
 0x770   : > { %v1035_v43 = vmul.f32 %v1376_v42, %v1033_v41  ;;  %vm1041_vm13 = vweird.f32 %v1376_v42 }
 0x771   : > { %vm1042_vm15 = vmor %vm1040_vm14, %vm1041_vm13 }
 0x772   : > { %v1036_v44 = vmul.f32 %v1376_v42, %v1035_v43 }
 0x774   : > { %v1037_v45 = vmul.f32 0.5, %v1036_v44 }
 0x776   : > { %v1038_v46 = vsub.f32 1.5, %v1037_v45 }
 0x778   : > { %v1039_v47 = vmul.f32 %v1376_v42, %v1038_v46 }
 0x77a   : > { %v1043_v49 = vsel %vm1042_vm15, %v1376_v42, %v1039_v47 }
 0x77b   : > { %v1044_v51 = vmul.f32 %v1043_v49, %v1027_v36 }
 0x77d   : > { %v1048_v52 = vmul.f32 %v1353_v48, %v1044_v51  ;;  %1057 = sbr.rel (%p1239_p3) target bundleno = 2198 (0x896), region = 92 }
 0x77f   : > { %v1052_v53 = vadd.f32 %v1354_v50, %v1048_v52 }
 0x781   : > { %1053 = vst.msk [vmem:[#allocation2] sm:$0xff] %vm537_vm1, %v1052_v53 }
 0x782   : > { %v1377_v7 = vld [vmem:[%s1952_s14] ss:$0 sm:$0xff] }
 0x788   : > { %v1058_v54 = vld [vmem:[#allocation2] sm:$0xff] }
 0x789   : > { %v1061_v55 = vsel %vm537_vm1, %v1058_v54, 0.0 }
 0x78a   : > { %1062 = vadd.xlane.f32.xlu0 %v1061_v55 }
 0x7fd   : > { %v1063_v56 = vpop.xlane.xlu0 %1062 }
 0x7fe   : > { %v1064_v57 = vmul.f32 %v1063_v56, %v1794_v58 }
 0x800   : > { %v1065_v59 = vsub.f32 %v1058_v54, %v1064_v57 }
 0x802   : > { %v1066_v60 = vmul.f32 %v1065_v59, %v1065_v59 }
 0x804   : > { %v1067_v61 = vsel %vm537_vm1, %v1066_v60, 0.0 }
 0x805   : > { %1068 = vadd.xlane.f32.xlu0 %v1067_v61 }
 0x878   : > { %v1069_v62 = vpop.xlane.xlu0 %1068 }
 0x879   : > { %v1070_v3 = vmul.f32 %v1069_v62, %v1794_v58  ;;  %v1378_v58 = vld [vmem:[%s1953_s24] ss:$0 sm:$0xff] }
 0x87b   : > { %v1071_v63 = vadd.f32 1e-05, %v1070_v3 }
 0x87d   : > { %1379 = vrsqrt.f32 %v1071_v63  ;;  %vm1078_vm2 = vweird.f32 %v1071_v63 }
 0x883   : > { %v1380_v0 = vpop.eup %1379 }
 0x884   : > { %v1073_v1 = vmul.f32 %v1380_v0, %v1071_v63  ;;  %vm1079_vm0 = vweird.f32 %v1380_v0 }
 0x885   : > { %vm1080_vm3 = vmor %vm1078_vm2, %vm1079_vm0 }
 0x886   : > { %v1074_v2 = vmul.f32 %v1380_v0, %v1073_v1 }
 0x888   : > { %v1075_v4 = vmul.f32 0.5, %v1074_v2 }
 0x88a   : > { %v1076_v5 = vsub.f32 1.5, %v1075_v4 }
 0x88c   : > { %v1077_v6 = vmul.f32 %v1380_v0, %v1076_v5 }
 0x88e   : > { %v1081_v8 = vsel %vm1080_vm3, %v1380_v0, %v1077_v6 }
 0x88f   : > { %v1082_v10 = vmul.f32 %v1081_v8, %v1065_v59 }
 0x891   : > { %v1086_v11 = vmul.f32 %v1377_v7, %v1082_v10 }
 0x893   : > { %v1090_v12 = vadd.f32 %v1378_v58, %v1086_v11 }
 0x895   : > { %1091 = vst.msk [vmem:[%s506_s15] sm:$0xff] %vm537_vm1, %v1090_v12 }
 0x896 PF: > { %s1954_s17 = sshll.u32 %s1497_s22, 3  ;;  %s1955_s23 = sld [smem:[#allocation25_spill]] }
 0x897   : > { %s1105_s14 = sshll.u32 %s506_s15, 4  ;;  %s1958_s29 = sand.u32 1, %s1485_s19   ;;  %s1106_s14 = int_to_ptr.vmem [resolvable:$true] %s1105_s14 }
 0x898   : > { %s1093_s24 = scalar_lea.sflag [#allocation9], %s1958_s29 }
 0x89c   : > { %s1956_s18 = smov %s1955_s23  ;;  %s1103_s30 = scalar_lea.hbm %s1955_s23, %s1954_s17 }
 0x89d   : > { %s1107_s27 = sshll.u32 %s1103_s30, 4  ;;  %s1431_s26 = scalar_lea.hbm %s1956_s18, 16  ;;  %s1108_s27 = int_to_ptr.hbm [resolvable:$true] %s1107_s27 }
 0x89e   : > { %s1425_s0 = sshra.s32 %s1108_s27, 4  ;;  %s1426_s0 = int_to_ptr.hbm [resolvable:$true] %s1425_s0 }
 0x89f   : > { %s1427_s1 = scalar_lea.hbm %s1426_s0, 8  ;;  %p1432_p4 = scmp.lt.s32.totalorder %s1426_s0, %s1956_s18 }
 0x8a0   : > { %p1428_p13 = scmp.ne.s32.totalorder %s1426_s0, %s1427_s1  ;;  %p1433_p5 = scmp.lt.s32.totalorder %s1431_s26, %s1427_s1 }
 0x8a2   : > { %p1429_p1 = pnand %p1428_p13, %p1666_p9  ;;  %p1434_p6 = por %p1433_p5, %p1432_p4 }
 0x8a4   : > { %p1430_p2 = pneg %p1429_p1 }
 0x8a6   : > { %p1435_p7 = pnand %p1434_p6, %p1430_p2 }
 0x8a8   : > { %1438 = shalt.err (!%p1435_p7)
}
 0x8a9   : > { %1256 = dma.vmem_to_hbm [thread:$0]  (%p1666_p9), %s1106_s14, 128, %s1108_s27, %s1093_s24  }
 0x8aa PF: > { %s1959_s28 = sld [smem:[#allocation13_spill]]  ;;  %p1266_p8 = scmp.ge.s32.totalorder %s1509_s25, 2 }
 0x8ac   : > { %p1263_p11 = pnand %p1266_p8, %p1670_p10 }
 0x8ae   : > { %p1264_p12 = pneg %p1263_p11 }
 0x8b0   : > { %s1119_s23 = sand.u32 1, %s1959_s28  }
 0x8b1   : > { %s1120_s30 = scalar_lea.sflag [#allocation9], %s1119_s23 }
 0x8b2   : > { %1476 = dma.done.wait (%p1264_p12), %s1120_s30, 128  }
 0x8b3   : > { %1478 = vsyncadd (%p1264_p12), %s1120_s30, 4294967168  ;;  %s29_s25 = sadd.s32 1, %s1509_s25   ;;  %s1961_s21 = sld [smem:[#allocation14_spill]] }
 0x8b4   : > { %p26_p0 = scmp.ge.s32.totalorder %s29_s25, 6   ;;  %s1962_s22 = sld [smem:[#allocation15_spill]] }
 0x8b5   : > { %s1963_s23 = sld [smem:[#allocation16_spill]] }
 0x8b6   : > { %s1964_s24 = sld [smem:[#allocation17_spill]]  ;;  %28 = sbr.rel (!%p26_p0) target bundleno = 14 (0xe), region = 135 }
 0x8b7   : > { %1965 = sst [smem:[#allocation13_spill]] %s1485_s19  ;;  %s1966_s19 = smov %s1489_s20 }
 0x8b8   : > { %s1967_s20 = smov %s1688_s13 }
 0x8bb   :  { %1126 = vsyncpa [#allocation8], 1 }
 0x8bc   :  { %1128 = vsyncpa [#allocation8 + $0x1], 1 }
 0x8bd   :  { %1129 = vsyncpa [#allocation9], 1 }
 0x8be   :  { %1131 = vsyncpa [#allocation9 + $0x1], 1 }

// kernel: tpu_custom_call.1
= control target key start
LH: loop header
LB: loop body
LE: loop exit
PB: predicated region body
PF: predicated region fallthrough
CT: control target
= control target key end

     0   :  { %s1910_s0 = inlined_call_operand.hbm [shape: f32[2,8,32], index: 0, kind: input, shape index: {}, may-alias: {0,15}]   ;;  %s1911_s1 = inlined_call_operand.vmem [shape: bf16[32,96], index: 1, kind: input, shape index: {}]   ;;  %s1912_s2 = inlined_call_operand.vmem [shape: f32[1,96], index: 2, kind: input, shape index: {}]   ;;  %s1913_s3 = inlined_call_operand.vmem [shape: bf16[32,32], index: 3, kind: input, shape index: {}]   ;;  %s1914_s4 = inlined_call_operand.vmem [shape: f32[1,32], index: 4, kind: input, shape index: {}]   ;;  %s1915_s5 = inlined_call_operand.vmem [shape: bf16[32,64], index: 5, kind: input, shape index: {}]   ;;  %s1916_s6 = inlined_call_operand.vmem [shape: f32[1,64], index: 6, kind: input, shape index: {}]   ;;  %s1917_s7 = inlined_call_operand.vmem [shape: bf16[64,32], index: 7, kind: input, shape index: {}]   ;;  %s1918_s8 = inlined_call_operand.vmem [shape: f32[1,32], index: 8, kind: input, shape index: {}]   ;;  %s1919_s9 = inlined_call_operand.vmem [shape: f32[1,32], index: 9, kind: input, shape index: {}]   ;;  %s1920_s10 = inlined_call_operand.vmem [shape: f32[1,32], index: 10, kind: input, shape index: {}]   ;;  %s1921_s11 = inlined_call_operand.vmem [shape: f32[1,32], index: 11, kind: input, shape index: {}]   ;;  %s1922_s12 = inlined_call_operand.vmem [shape: f32[1,32], index: 12, kind: input, shape index: {}]   ;;  %s1923_s13 = inlined_call_operand.vmem [shape: f32[1,32], index: 13, kind: input, shape index: {}]   ;;  %s1924_s14 = inlined_call_operand.vmem [shape: f32[1,32], index: 14, kind: input, shape index: {}]   ;;  %s1925_s15 = inlined_call_operand.hbm [shape: f32[2,8,32], index: 15, kind: output, shape index: {}, may-alias: {0,15}]  }
   0x1   :  { %1931 = sst [smem:[#allocation18_spill]] %s1910_s0 }
   0x2   :  { %1932 = sst [smem:[#allocation19_spill]] %s1911_s1 }
   0x3   :  { %1933 = sst [smem:[#allocation20_spill]] %s1912_s2 }
   0x4   :  { %1934 = sst [smem:[#allocation21_spill]] %s1913_s3 }
   0x5   :  { %1935 = sst [smem:[#allocation22_spill]] %s1918_s8 }
   0x6   :  { %1936 = sst [smem:[#allocation23_spill]] %s1921_s11 }
   0x7   :  { %1937 = sst [smem:[#allocation24_spill]] %s1922_s12 }
   0x8   :  { %1938 = sst [smem:[#allocation25_spill]] %s1923_s13 }
   0x9   :  { %1939 = sst [smem:[#allocation26_spill]] %s1924_s14 }
   0xa   :  { %1940 = sst [smem:[#allocation27_spill]] %s1925_s15 }
   0xb   :  { %20 = vsyncpa [#allocation8], 0 }
   0xc   :  { %22 = vsyncpa [#allocation8 + $0x1], 0 }
   0xd   :  { %23 = vsyncpa [#allocation9], 0 }
   0xe   :  { %25 = vsyncpa [#allocation9 + $0x1], 0  ;;  %s1635_s18 = smov 0   ;;  %s1637_s19 = smov 0  }
   0xf   :  { %s1639_s20 = smov 0   ;;  %s1641_s21 = smov 0  }
  0x10   :  { %s1643_s22 = smov 0   ;;  %s1645_s23 = smov 0  }
  0x11   :  { %s1647_s24 = smov 0   ;;  %s1649_s25 = smov 0  }
  0x12 LB: > { %1941 = sst [smem:[#allocation13_spill]] %s1510_s18  ;;  %s1206_s26 = sadd.s32 4294967295, %s1538_s25   ;;  %s1538_s25 = sphi %s1649_s25, %s31_s25   ;;  %s1534_s24 = sphi %s1647_s24, %s1969_s24   ;;  %s1530_s23 = sphi %s1645_s23, %s1964_s23   ;;  %s1526_s22 = sphi %s1643_s22, %s1968_s22   ;;  %s1522_s21 = sphi %s1641_s21, %s1963_s21   ;;  %s1518_s20 = sphi %s1639_s20, %s1967_s20   ;;  %s1514_s19 = sphi %s1637_s19, %s1966_s19   ;;  %s1510_s18 = sphi %s1635_s18, %s1965_s18  }
  0x13   : > { %1942 = sst [smem:[#allocation14_spill]] %s1526_s22  ;;  %s1207_s27 = sadd.s32 4294967294, %s1538_s25  }
  0x14   : > { %1943 = sst [smem:[#allocation15_spill]] %s1530_s23  ;;  %s40_s28 = sadd.s32 1, %s1530_s23 }
  0x15   : > { %s43_s29 = sadd.s32 1, %s1534_s24  ;;  %p41_p0 = scmp.ge.s32.totalorder %s40_s28, 2 }
  0x16   : > { %s50_s30 = sadd.s32 1, %s1518_s20  ;;  %p57_p1 = scmp.ne.s32.totalorder %s1518_s20, %s1514_s19 }
  0x17   : > { %p58_p2 = scmp.eq.s32.totalorder %s1538_s25, 0  ;;  %s1971_s28 = smov (%p41_p0, %s40_s28), 0 }
  0x18   : > { %1944 = sst [smem:[#allocation16_spill]] %s1971_s28  ;;  %s1973_s29 = smov (!%p41_p0, %s43_s29), %s1534_s24 }
  0x19   : > { %p1686_p3 = por %p58_p2, %p57_p1  ;;  %p63_p4 = scmp.ne.s32.totalorder %s1514_s19, %s1510_s18 }
  0x1a   : > { %p45_p5 = scmp.ge.s32.totalorder %s1973_s29, 2  ;;  %p64_p6 = scmp.eq.s32.totalorder %s1206_s26, 0 }
  0x1b   : > { %p381_p7 = scmp.eq.s32.totalorder %s1206_s26, 3  ;;  %p387_p8 = scmp.eq.s32.totalorder %s1207_s27, 3 }
  0x1c   : > { %s1975_s29 = smov (%p45_p5, %s1973_s29), 0  ;;  %p1694_p9 = por %p64_p6, %p63_p4 }
  0x1d   : > { %p1698_p10 = por %p381_p7, %p57_p1  ;;  %s47_s23 = ssub.s32 %s1534_s24, %s1975_s29 }
  0x1e   : > { %p1704_p11 = por %p387_p8, %p63_p4  ;;  %p48_p12 = scmp.eq.s32.totalorder %s47_s23, 0 }
  0x1f   : > { %s1947_s28 = scalar_select %p1698_p10, 1, 0 }
  0x20   : > { %p1295_p13 = scmp.lt.s32.totalorder %s1538_s25, 4  ;;  %s449_s26 = sand.u32 1, %s1518_s20  }
  0x21   : > { %1948 = sst [smem:[#allocation17_spill]] %s1947_s28  ;;  %s1210_s15 = sshll.u32 %s449_s26, 3 }
  0x22   : > { %s1711_s27 = scalar_select %p48_p12, %s1518_s20, %s50_s30  }
  0x23   : > { %s1211_s22 = sshll.u32 %s1534_s24, 3  ;;  %s1950_s0 = sld [smem:[#allocation18_spill]] }
  0x24   : > { %s453_s11 = scalar_lea.vmem [#allocation7], %s1210_s15  ;;  %p1288_p0 = pnand %p1295_p13, %p1686_p3 }
  0x25   : > { %s461_s28 = sshll.u32 %s453_s11, 4  ;;  %p1212_p1 = scmp.ge.s32.totalorder %s1538_s25, 1  ;;  %s462_s28 = int_to_ptr.vmem [resolvable:$true] %s461_s28 }
  0x26   : > { %p466_p2 = scmp.lt.s32.totalorder %s1538_s25, 5  ;;  %s450_s23 = scalar_lea.sflag [#allocation8], %s449_s26 }
  0x28   : > { %p467_p4 = pnand %p1212_p1, %p466_p2 }
  0x29   : > { %s457_s12 = scalar_lea.hbm %s1950_s0, %s1211_s22  ;;  %s1722_s30 = sand.u32 (!%p467_p4), 1, %s1514_s19  }
  0x2a   : > { %s459_s8 = sshll.u32 %s457_s12, 4  ;;  %470 = sbr.rel (%p467_p4) target bundleno = 2209 (0x8a1), region = 80  ;;  %s460_s8 = int_to_ptr.hbm [resolvable:$true] %s459_s8 }
  0x2b   : > { %1290 = dma.hbm_to_vmem [thread:$0]  (!%p1288_p0), %s460_s8, 128, %s462_s28, %s450_s23  }
  0x2c   : > { %s1213_s13 = sshll.u32 (!%p467_p4), %s1722_s30, 3  ;;  %s473_s14 = scalar_lea.sflag (!%p467_p4), [#allocation8], %s1722_s30 }
  0x2d   : > { %s476_s11 = scalar_lea.vmem (!%p467_p4), [#allocation7], %s1213_s13 }
  0x2f   : > { %1501 = dma.done.wait (%p1694_p9), %s473_s14, 128  }
  0x30   : > { %1503 = vsyncadd (%p1694_p9), %s473_s14, 4294967168  ;;  %s1730_s12 = scalar_lea.vmem [#allocation10], %s1213_s13  ;;  %p1215_p3 = scmp.ne.s32.totalorder %s1522_s21, 0 }
  0x32   : > { %528 = sbr.rel (%p1215_p3) target bundleno = 57 (0x39), region = 88 }
  0x37   : > { %v529_v0 = vld [vmem:[%s476_s11] sm:$0xff]  ;;  %vm530_vm0 = vcmask 261120  }
  0x38   : > { %531 = vst.msk [vmem:[#allocation2] sm:$0xff] %vm530_vm0, %v529_v0 }
  0x39 PF: > { %s1951_s1 = sld [smem:[#allocation19_spill]]  ;;  %vm554_vm1 = vcmask 261120   ;;  %vm573_vm2 = vcmask 60416   ;;  %s1540_s26 = smov 72   ;;  %vm643_vm3 = vcmask 64512   ;;  %vm771_vm4 = vcmask 1043456  }
  0x3a   : > { %s1952_s2 = sld [smem:[#allocation20_spill]]  ;;  %s1541_s23 = smov 88   ;;  %vm852_vm5 = vcmask 126016   ;;  %vm859_vm6 = vcmask 191616   ;;  %vm866_vm7 = vcmask 257216   ;;  %vm1020_vm12 = vcmask 523264  }
  0x3b   : > { %s1542_s13 = smov 120   ;;  %s1543_s14 = smov 80  }
  0x3c   : > { %s1544_s11 = smov 104   ;;  %s1545_s8 = smov 112  }
  0x3d   : > { %s1546_s15 = smov 96   ;;  %s1547_s22 = smov 48  }
  0x3e   : > { %s1548_s28 = smov 64   ;;  %s1549_s16 = smov 56  }
  0x3f   : > { %v1274_v1 = vld [vmem:[%s1951_s1 + $0x8] sm:$0xff]  ;;  %v1273_v2 = vld [vmem:[%s1951_s1] sm:$0xff]  ;;  %s1550_s17 = smov 40   ;;  %s1953_s3 = sld [smem:[#allocation21_spill]] }
  0x40   : > { %v1739_v3 = vld [vmem:[#allocation2] sm:$0xff]  ;;  %564 = vmatpush.bf16.msra.mxu0 %v1274_v1  ;;  %p1268_p5 = scmp.ne.s32.totalorder %s1522_s21, 1 }
  0x41   : > { %v533_v4 = vpack.c.bf16 %v1739_v3, %v1739_v3  ;;  %v1376_v5 = vld [vmem:[%s1952_s2] ss:$0 sm:$0xff] }
  0x44   : > { %565 = vmatpush.bf16.msra.mxu0 %v1273_v2 }
  0x47   : > { %1224 = vmatmul.msk.bf16.vlgmr.msra.gmra.mxu0 %vm554_vm1, %v533_v4 }
  0xc4   : > { %v567_v6 = vpop.f32.mrf.mxu0 }
  0xc5   : > { %v568_v7 = vadd.f32 %v1376_v5, %v567_v6 }
  0xc7   : > { %v571_v8 = vmul.f32 0.35355338, %v568_v7  ;;  %v1747_v9 = vpack.c.bf16 %v568_v7, %v568_v7 }
  0xc9   : > { %v572_v10 = vpack.c.bf16 %v571_v8, %v571_v8  ;;  %621 = vrot.lane.b32.xlu2 %v1747_v9, %s1540_s26  ;;  %591 = vrot.lane.b32.xlu0 %v1747_v9, %s1541_s23  ;;  %s1551_s26 = smov 8   ;;  %s1552_s23 = smov 16  }
  0xcb   : > { %574 = vst.msk [vmem:[#allocation3] sm:$0xf] %vm573_vm2, %v572_v10  ;;  %586 = vrot.lane.b32.xlu1 %v572_v10, %s1542_s13  ;;  %s1553_s13 = smov 24  }
  0xcc   : > { %v569_v11 = vpop.f32.mrf.mxu0 }
  0xd1   : > { %606 = vrot.lane.b32.xlu0 %v1747_v9, %s1543_s14  ;;  %616 = vrot.lane.b32.xlu2 %v572_v10, %s1544_s11  ;;  %s1957_s11 = sld [smem:[#allocation25_spill]] (!%p1268_p5) }
  0xd2   : > { %v631_v30 = vld [vmem:[#allocation3] sm:$0xf] }
  0xd3   : > { %601 = vrot.lane.b32.xlu1 %v572_v10, %s1545_s8 }
  0xd9   : > { %577 = vrot.lane.b32.xlu0 %v1747_v9, %s1546_s15 }
 0x123   : > { %v622_v12 = vpop.permute.xlu2 %621 }
 0x124   : > { %625 = vst.msk [vmem:[#allocation4 + $0xc] sm:$0xf] %vm573_vm2, %v622_v12 }
 0x12b   : > { %v617_v13 = vpop.permute.xlu2 %616  ;;  %v638_v14 = vld [vmem:[#allocation4 + $0xc] sm:$0xf] }
 0x12c   : > { %620 = vst.msk [vmem:[#allocation3 + $0xc] sm:$0xf] %vm573_vm2, %v617_v13  ;;  %v705_v15 = vsel %vm643_vm3, %v638_v14, 0 }
 0x12d   : > { %714 = vmatpush.bf16.xpose.msrb.mxu0 %v705_v15 }
 0x133   : > { %v634_v16 = vld [vmem:[#allocation3 + $0xc] sm:$0xf] }
 0x134   : > { %1228 = vmatmul.msk.bf16.vlgmr.msrb.gmra.mxu0 %vm643_vm3, %v634_v16 }
 0x13b   : > { %v592_v17 = vpop.permute.xlu0 %591 }
 0x13c   : > { %595 = vst.msk [vmem:[#allocation4 + $0x4] sm:$0xf] %vm573_vm2, %v592_v17 }
 0x13d   : > { %v587_v18 = vpop.permute.xlu1 %586 }
 0x13e   : > { %590 = vst.msk [vmem:[#allocation3 + $0x4] sm:$0xf] %vm573_vm2, %v587_v18 }
 0x143   : > { %v607_v19 = vpop.permute.xlu0 %606  ;;  %v636_v20 = vld [vmem:[#allocation4 + $0x4] sm:$0xf] }
 0x144   : > { %610 = vst.msk [vmem:[#allocation4 + $0x8] sm:$0xf] %vm573_vm2, %v607_v19  ;;  %v667_v21 = vsel %vm643_vm3, %v636_v20, 0 }
 0x145   : > { %676 = vmatpush.bf16.xpose.msra.mxu2 %v667_v21  ;;  %v602_v22 = vpop.permute.xlu1 %601  ;;  %v632_v24 = vld [vmem:[#allocation3 + $0x4] sm:$0xf] }
 0x146   : > { %605 = vst.msk [vmem:[#allocation3 + $0x8] sm:$0xf] %vm573_vm2, %v602_v22 }
 0x14b   : > { %v578_v23 = vpop.permute.xlu0 %577  ;;  %v637_v25 = vld [vmem:[#allocation4 + $0x8] sm:$0xf] }
 0x14c   : > { %580 = vst.msk [vmem:[#allocation4] sm:$0xf] %vm573_vm2, %v578_v23  ;;  %1226 = vmatmul.msk.bf16.vlgmr.msra.gmra.mxu2 %vm643_vm3, %v632_v24  ;;  %v686_v26 = vsel %vm643_vm3, %v637_v25, 0 }
 0x14d   : > { %695 = vmatpush.bf16.xpose.msra.mxu3 %v686_v26  ;;  %v633_v27 = vld [vmem:[#allocation3 + $0x8] sm:$0xf] }
 0x153   : > { %v635_v28 = vld [vmem:[#allocation4] sm:$0xf] }
 0x154   : > { %1227 = vmatmul.msk.bf16.vlgmr.msra.gmra.mxu3 %vm643_vm3, %v633_v27  ;;  %v648_v29 = vsel %vm643_vm3, %v635_v28, 0 }
 0x155   : > { %657 = vmatpush.bf16.xpose.msra.mxu1 %v648_v29 }
 0x15c   : > { %1225 = vmatmul.msk.bf16.vlgmr.msra.gmra.mxu1 %vm643_vm3, %v631_v30 }
 0x1b1   : > { %v716_v31 = vpop.f32.mrf.mxu0 }
 0x1b2   : > { %v729_v32 = vsel %vm643_vm3, %v716_v31, -inf }
 0x1b3   : > { %730 = vmax.xlane.f32.xlu0 %v729_v32 }
 0x1b9   : > { %v718_v33 = vpop.f32.mrf.mxu0 }
 0x1c7   : > { %611 = vrot.lane.b32.xlu0 %v1747_v9, %s1547_s22  ;;  %s1954_s22 = sld [smem:[#allocation22_spill]] }
 0x1cf   : > { %581 = vrot.lane.b32.xlu0 %v1747_v9, %s1548_s28  ;;  %v678_v34 = vpop.f32.mrf.mxu2 }
 0x1d0   : > { %v723_v35 = vsel %vm643_vm3, %v678_v34, -inf }
 0x1d1   : > { %724 = vmax.xlane.f32.xlu1 %v723_v35 }
 0x1d7   : > { %v680_v36 = vpop.f32.mrf.mxu2  ;;  %v697_v37 = vpop.f32.mrf.mxu3 }
 0x1d8   : > { %v726_v38 = vsel %vm643_vm3, %v697_v37, -inf }
 0x1d9   : > { %727 = vmax.xlane.f32.xlu2 %v726_v38  ;;  %v659_v39 = vpop.f32.mrf.mxu1 }
 0x1da   : > { %v720_v41 = vsel %vm643_vm3, %v659_v39, -inf }
 0x1df   : > { %v699_v40 = vpop.f32.mrf.mxu3 }
 0x1e0   : > { %v1276_v40 = vld [vmem:[%s1953_s3 + $0x8] sm:$0xff] }
 0x1e1   : > { %721 = vmax.xlane.f32.xlu2 %v720_v41  ;;  %v661_v42 = vpop.f32.mrf.mxu1  ;;  %v1275_v41 = vld [vmem:[%s1953_s3] sm:$0xff] }
 0x1ea   : > { %596 = vrot.lane.b32.xlu1 %v1747_v9, %s1549_s16 }
 0x226   : > { %v731_v43 = vpop.xlane.xlu0 %730 }
 0x227   : > { %v735_v44 = vsub.f32 %v716_v31, %v731_v43 }
 0x229   : > { %v742_v45 = vmul.f32 1.442695, %v735_v44 }
 0x22b   : > { %1384 = vpow2.f32 %v742_v45 }
 0x231   : > { %v1385_v46 = vpop.eup %1384 }
 0x232   : > { %v753_v47 = vsel %vm643_vm3, %v1385_v46, 0.0 }
 0x233   : > { %754 = vadd.xlane.f32.xlu1 %v753_v47 }
 0x239   : > { %v612_v48 = vpop.permute.xlu0 %611 }
 0x23a   : > { %615 = vst.msk [vmem:[#allocation5 + $0x8] sm:$0xf] %vm573_vm2, %v612_v48 }
 0x241   : > { %v582_v49 = vpop.permute.xlu0 %581  ;;  %v641_v50 = vld [vmem:[#allocation5 + $0x8] sm:$0xf] }
 0x242   : > { %584 = vst.msk [vmem:[#allocation5] sm:$0xf] %vm573_vm2, %v582_v49  ;;  %v811_v51 = vsel %vm771_vm4, %v641_v50, 0 }
 0x243   : > { %820 = vmatpush.bf16.msrb.mxu3 %v811_v51 }
 0x244   : > { %v725_v52 = vpop.xlane.xlu1 %724 }
 0x245   : > { %v733_v53 = vsub.f32 %v678_v34, %v725_v52  ;;  %v1554_v52 = vmov 32.0  }
 0x247   : > { %v738_v54 = vmul.f32 1.442695, %v733_v53 }
 0x249   : > { %1386 = vpow2.f32 %v738_v54  ;;  %v639_v55 = vld [vmem:[#allocation5] sm:$0xf] }
 0x24a   : > { %v773_v56 = vsel %vm771_vm4, %v639_v55, 0 }
 0x24b   : > { %782 = vmatpush.bf16.msrb.mxu1 %v773_v56 }
 0x24c   : > { %v728_v57 = vpop.xlane.xlu2 %727 }
 0x24d   : > { %v734_v58 = vsub.f32 %v697_v37, %v728_v57 }
 0x24f   : > { %v1387_v59 = vpop.eup %1386  ;;  %v740_v60 = vmul.f32 1.442695, %v734_v58  ;;  %898 = vmatpush.bf16.msra.mxu1 %v1276_v40 }
 0x250   : > { %v747_v61 = vsel %vm643_vm3, %v1387_v59, 0.0 }
 0x251   : > { %1388 = vpow2.f32 %v740_v60  ;;  %748 = vadd.xlane.f32.xlu2 %v747_v61 }
 0x253   : > { %899 = vmatpush.bf16.msra.mxu1 %v1275_v41 }
 0x254   : > { %v722_v62 = vpop.xlane.xlu2 %721 }
 0x255   : > { %v732_v63 = vsub.f32 %v659_v39, %v722_v62 }
 0x257   : > { %v1389_v0 = vpop.eup %1388  ;;  %v736_v1 = vmul.f32 1.442695, %v732_v63  ;;  %v1278_v63 = vld [vmem:[%s1915_s5 + $0x8] sm:$0xff] }
 0x258   : > { %v750_v2 = vsel %vm643_vm3, %v1389_v0, 0.0 }
 0x259   : > { %1390 = vpow2.f32 %v736_v1  ;;  %751 = vadd.xlane.f32.xlu2 %v750_v2  ;;  %v1282_v1 = vld [vmem:[%s1917_s7 + $0x18] sm:$0xff] }
 0x25a   : > { %1028 = vmatpush.bf16.msra.mxu3 %v1282_v1 }
 0x25c   : > { %v597_v4 = vpop.permute.xlu1 %596 }
 0x25d   : > { %600 = vst.msk [vmem:[#allocation5 + $0x4] sm:$0xf] %vm573_vm2, %v597_v4 }
 0x25f   : > { %v1391_v5 = vpop.eup %1390 }
 0x260   : > { %v744_v6 = vsel %vm643_vm3, %v1391_v5, 0.0 }
 0x261   : > { %745 = vadd.xlane.f32.xlu0 %v744_v6 }
 0x264   : > { %v640_v7 = vld [vmem:[#allocation5 + $0x4] sm:$0xf] }
 0x265   : > { %v792_v8 = vsel %vm771_vm4, %v640_v7, 0 }
 0x266   : > { %801 = vmatpush.bf16.msrb.mxu2 %v792_v8 }
 0x26a   : > { %975 = vmatpush.bf16.msra.mxu2 %v1278_v63 }
 0x271   : > { %626 = vrot.lane.b32.xlu2 %v1747_v9, %s1550_s17  ;;  %s1955_s17 = sld [smem:[#allocation23_spill]] }
 0x2a6   : > { %v755_v15 = vpop.xlane.xlu1 %754 }
 0x2c4   : > { %v749_v10 = vpop.xlane.xlu2 %748 }
 0x2c5   : > { %1392 = vrcp.f32 %v749_v10 }
 0x2cb   : > { %v1393_v11 = vpop.eup %1392 }
 0x2cc   : > { %v761_v12 = vmul.f32 %v1393_v11, %v1387_v59  ;;  %v752_v13 = vpop.xlane.xlu2 %751 }
 0x2cd   : > { %1394 = vrcp.f32 %v752_v13 }
 0x2ce   : > { %v765_v14 = vpack.c.bf16 %v761_v12, %v761_v12  ;;  %1396 = vrcp.f32 %v755_v15 }
 0x2d0   : > { %1230 = vmatmul.msk.bf16.vlgmr.msrb.gmra.mxu2 %vm643_vm3, %v765_v14  ;;  %v1378_v14 = vld [vmem:[%s1919_s9] ss:$0 sm:$0xff] }
 0x2d3   : > { %v1395_v16 = vpop.eup %1394 }
 0x2d4   : > { %v762_v17 = vmul.f32 %v1395_v16, %v1389_v0  ;;  %v746_v18 = vpop.xlane.xlu0 %745  ;;  %v627_v19 = vpop.permute.xlu2 %626  ;;  %v1277_v0 = vld [vmem:[%s1915_s5] sm:$0xff] }
 0x2d5   : > { %1398 = vrcp.f32 %v746_v18  ;;  %630 = vst.msk [vmem:[#allocation5 + $0xc] sm:$0xf] %vm573_vm2, %v627_v19  ;;  %v1397_v9 = vpop.eup %1396  ;;  %976 = vmatpush.bf16.msra.mxu2 %v1277_v0  ;;  %v1379_v16 = vld [vmem:[%s1920_s10] ss:$0 sm:$0xff] }
 0x2d6   : > { %v766_v20 = vpack.c.bf16 %v762_v17, %v762_v17  ;;  %v763_v22 = vmul.f32 %v1397_v9, %v1385_v46  ;;  %v1377_v46 = vld [vmem:[%s1914_s4] ss:$0 sm:$0xff]  ;;  %1400 = vrcp.f32 %v1554_v52  ;;  %v1280_v9 = vld [vmem:[%s1917_s7 + $0x8] sm:$0xff] }
 0x2d8   : > { %1231 = vmatmul.msk.bf16.vlgmr.msrb.gmra.mxu3 %vm643_vm3, %v766_v20  ;;  %v767_v27 = vpack.c.bf16 %v763_v22, %v763_v22  ;;  %v1380_v22 = vld [vmem:[%s1916_s6] ss:$0 sm:$0xff] }
 0x2db   : > { %v1399_v21 = vpop.eup %1398 }
 0x2dc   : > { %v760_v23 = vmul.f32 %v1399_v21, %v1391_v5  ;;  %v642_v24 = vld [vmem:[#allocation5 + $0xc] sm:$0xf]  ;;  %v1401_v53 = vpop.eup %1400  ;;  %v1279_v21 = vld [vmem:[%s1917_s7] sm:$0xff] }
 0x2dd   : > { %v830_v25 = vsel %vm771_vm4, %v642_v24, 0  ;;  %v912_v54 = vmul.f32 32.0, %v1401_v53  ;;  %vm916_vm8 = vweird.f32 %v1401_v53  ;;  %v1281_v5 = vld [vmem:[%s1917_s7 + $0x10] sm:$0xff] }
 0x2de   : > { %839 = vmatpush.bf16.msra.mxu0 %v830_v25  ;;  %v764_v26 = vpack.c.bf16 %v760_v23, %v760_v23  ;;  %1029 = vmatpush.bf16.msra.mxu3 %v1281_v5 }
 0x2df   : > { %v913_v55 = vsub.f32 1.0, %v912_v54 }
 0x2e0   : > { %1229 = vmatmul.msk.bf16.vlgmr.msrb.gmra.mxu1 %vm643_vm3, %v764_v26 }
 0x2e1   : > { %1232 = vmatmul.msk.bf16.vlgmr.msra.gmra.mxu0 %vm643_vm3, %v767_v27  ;;  %v914_v56 = vmul.f32 %v1401_v53, %v913_v55 }
 0x2e2   : > { %1030 = vmatpush.bf16.msra.mxu3 %v1280_v9 }
 0x2e3   : > { %v915_v57 = vadd.f32 %v1401_v53, %v914_v56 }
 0x2e5   : > { %v1806_v58 = vsel %vm916_vm8, %v1401_v53, %v915_v57 }
 0x2e6   : > { %1031 = vmatpush.bf16.msra.mxu3 %v1279_v21 }
 0x353   : > { %v803_v28 = vpop.f32.mrf.mxu2 }
 0x354   : > { %v847_v29 = vpack.c.bf16 %v803_v28, %v803_v28  ;;  %v1381_v28 = vld [vmem:[%s1954_s22] ss:$0 sm:$0xff]  ;;  %s1958_s22 = sld [smem:[#allocation26_spill]] (!%p1268_p5) }
 0x356   : > { %849 = vrot.lane.b32.xlu2 %v847_v29, %s1551_s26 }
 0x35b   : > { %v805_v30 = vpop.f32.mrf.mxu2  ;;  %v822_v31 = vpop.f32.mrf.mxu3 }
 0x35c   : > { %v854_v32 = vpack.c.bf16 %v822_v31, %v822_v31 }
 0x35d   : > { %v784_v33 = vpop.f32.mrf.mxu1 }
 0x35e   : > { %v845_v34 = vpack.c.bf16 %v784_v33, %v784_v33  ;;  %856 = vrot.lane.b32.xlu2 %v854_v32, %s1552_s23  ;;  %v841_v35 = vpop.f32.mrf.mxu0 }
 0x35f   : > { %v861_v37 = vpack.c.bf16 %v841_v35, %v841_v35 }
 0x360   : > { %846 = vst.msk [vmem:[#allocation6] sm:$0xf] %vm573_vm2, %v845_v34 }
 0x363   : > { %v824_v36 = vpop.f32.mrf.mxu3 }
 0x365   : > { %v786_v38 = vpop.f32.mrf.mxu1 }
 0x366   : > { %863 = vrot.lane.b32.xlu2 %v861_v37, %s1553_s13  ;;  %v843_v39 = vpop.f32.mrf.mxu0  ;;  %s1956_s13 = sld [smem:[#allocation24_spill]] }
 0x3b0   : > { %v850_v42 = vpop.permute.xlu2 %849 }
 0x3b1   : > { %853 = vst.msk [vmem:[#allocation6] sm:$0xf] %vm852_vm5, %v850_v42 }
 0x3b8   : > { %v857_v43 = vpop.permute.xlu2 %856 }
 0x3b9   : > { %860 = vst.msk [vmem:[#allocation6] sm:$0xf] %vm859_vm6, %v857_v43 }
 0x3c0   : > { %v864_v44 = vpop.permute.xlu2 %863 }
 0x3c1   : > { %867 = vst.msk [vmem:[#allocation6] sm:$0xf] %vm866_vm7, %v864_v44 }
 0x3c8   : > { %v868_v45 = vld [vmem:[#allocation6] sm:$0xf] }
 0x3c9   : > { %1241 = vmatmul.msk.bf16.vlgmr.msra.gmra.mxu1 %vm554_vm1, %v868_v45 }
 0x446   : > { %v901_v47 = vpop.f32.mrf.mxu1 }
 0x447   : > { %v902_v48 = vadd.f32 %v1377_v46, %v901_v47 }
 0x449   : > { %v905_v49 = vadd.f32 %v902_v48, %v1739_v3  ;;  %v1382_v48 = vld [vmem:[%s1955_s17] ss:$0 sm:$0xff] }
 0x44b   : > { %v908_v50 = vsel %vm554_vm1, %v905_v49, 0.0 }
 0x44c   : > { %909 = vadd.xlane.f32.xlu1 %v908_v50  ;;  %v1383_v50 = vld [vmem:[%s1956_s13] ss:$0 sm:$0xff] }
 0x44e   : > { %v903_v51 = vpop.f32.mrf.mxu1 }
 0x4bf   : > { %v910_v59 = vpop.xlane.xlu1 %909 }
 0x4c0   : > { %v918_v60 = vmul.f32 %v1806_v58, %v910_v59 }
 0x4c2   : > { %v919_v61 = vsub.f32 %v905_v49, %v918_v60 }
 0x4c4   : > { %v920_v62 = vmul.f32 %v919_v61, %v919_v61 }
 0x4c6   : > { %v921_v3 = vsel %vm554_vm1, %v920_v62, 0.0 }
 0x4c7   : > { %922 = vadd.xlane.f32.xlu2 %v921_v3 }
 0x53a   : > { %v923_v2 = vpop.xlane.xlu2 %922 }
 0x53b   : > { %v924_v4 = vmul.f32 %v923_v2, %v1806_v58 }
 0x53d   : > { %v925_v6 = vadd.f32 1e-05, %v924_v4 }
 0x53f   : > { %1402 = vrsqrt.f32 %v925_v6  ;;  %vm932_vm10 = vweird.f32 %v925_v6 }
 0x545   : > { %v1403_v7 = vpop.eup %1402 }
 0x546   : > { %v927_v8 = vmul.f32 %v1403_v7, %v925_v6  ;;  %vm933_vm9 = vweird.f32 %v1403_v7 }
 0x547   : > { %vm934_vm11 = vmor %vm932_vm10, %vm933_vm9 }
 0x548   : > { %v928_v10 = vmul.f32 %v1403_v7, %v927_v8 }
 0x54a   : > { %v929_v11 = vmul.f32 0.5, %v928_v10 }
 0x54c   : > { %v930_v12 = vsub.f32 1.5, %v929_v11 }
 0x54e   : > { %v931_v13 = vmul.f32 %v1403_v7, %v930_v12 }
 0x550   : > { %v935_v15 = vsel %vm934_vm11, %v1403_v7, %v931_v13 }
 0x551   : > { %v936_v17 = vmul.f32 %v935_v15, %v919_v61 }
 0x553   : > { %v940_v18 = vmul.f32 %v1378_v14, %v936_v17 }
 0x555   : > { %v944_v19 = vadd.f32 %v1379_v16, %v940_v18 }
 0x557   : > { %v945_v20 = vpack.c.bf16 %v944_v19, %v944_v19 }
 0x559   : > { %1250 = vmatmul.msk.bf16.vlgmr.msra.gmra.mxu2 %vm554_vm1, %v945_v20 }
 0x5dc   : > { %v978_v23 = vpop.f32.mrf.mxu2 }
 0x5dd   : > { %v979_v24 = vadd.f32 %v1380_v22, %v978_v23 }
 0x5df   : > { %v982_v25 = vmax.f32 %v979_v24, 0.0 }
 0x5e1   : > { %v983_v26 = vpack.c.bf16 %v982_v25, %v982_v25 }
 0x5e3   : > { %1267 = vmatmul.msk.bf16.vlgmr.msra.gmra.mxu3 %vm1020_vm12, %v983_v26 }
 0x5e4   : > { %v980_v27 = vpop.f32.mrf.mxu2 }
 0x666   : > { %v1033_v29 = vpop.f32.mrf.mxu3 }
 0x667   : > { %v1034_v30 = vadd.f32 %v1381_v28, %v1033_v29 }
 0x669   : > { %v1037_v31 = vadd.f32 %v1034_v30, %v944_v19 }
 0x66b   : > { %v1040_v32 = vsel %vm554_vm1, %v1037_v31, 0.0 }
 0x66c   : > { %1041 = vadd.xlane.f32.xlu1 %v1040_v32 }
 0x66e   : > { %v1035_v33 = vpop.f32.mrf.mxu3 }
 0x6df   : > { %v1042_v34 = vpop.xlane.xlu1 %1041 }
 0x6e0   : > { %v1043_v35 = vmul.f32 %v1042_v34, %v1806_v58 }
 0x6e2   : > { %v1044_v36 = vsub.f32 %v1037_v31, %v1043_v35 }
 0x6e4   : > { %v1045_v37 = vmul.f32 %v1044_v36, %v1044_v36 }
 0x6e6   : > { %v1046_v38 = vsel %vm554_vm1, %v1045_v37, 0.0 }
 0x6e7   : > { %1047 = vadd.xlane.f32.xlu0 %v1046_v38 }
 0x75a   : > { %v1048_v39 = vpop.xlane.xlu0 %1047 }
 0x75b   : > { %v1049_v40 = vmul.f32 %v1048_v39, %v1806_v58 }
 0x75d   : > { %v1050_v41 = vadd.f32 1e-05, %v1049_v40 }
 0x75f   : > { %1404 = vrsqrt.f32 %v1050_v41  ;;  %vm1057_vm14 = vweird.f32 %v1050_v41 }
 0x765   : > { %v1405_v42 = vpop.eup %1404 }
 0x766   : > { %v1052_v43 = vmul.f32 %v1405_v42, %v1050_v41  ;;  %vm1058_vm13 = vweird.f32 %v1405_v42 }
 0x767   : > { %vm1059_vm15 = vmor %vm1057_vm14, %vm1058_vm13 }
 0x768   : > { %v1053_v44 = vmul.f32 %v1405_v42, %v1052_v43 }
 0x76a   : > { %v1054_v45 = vmul.f32 0.5, %v1053_v44 }
 0x76c   : > { %v1055_v46 = vsub.f32 1.5, %v1054_v45 }
 0x76e   : > { %v1056_v47 = vmul.f32 %v1405_v42, %v1055_v46 }
 0x770   : > { %v1060_v49 = vsel %vm1059_vm15, %v1405_v42, %v1056_v47 }
 0x771   : > { %v1061_v51 = vmul.f32 %v1060_v49, %v1044_v36 }
 0x773   : > { %v1065_v52 = vmul.f32 %v1382_v48, %v1061_v51  ;;  %1074 = sbr.rel (%p1268_p5) target bundleno = 2188 (0x88c), region = 92 }
 0x775   : > { %v1069_v53 = vadd.f32 %v1383_v50, %v1065_v52 }
 0x777   : > { %1070 = vst.msk [vmem:[#allocation2] sm:$0xff] %vm554_vm1, %v1069_v53 }
 0x778   : > { %v1406_v7 = vld [vmem:[%s1957_s11] ss:$0 sm:$0xff] }
 0x77e   : > { %v1075_v54 = vld [vmem:[#allocation2] sm:$0xff] }
 0x77f   : > { %v1078_v55 = vsel %vm554_vm1, %v1075_v54, 0.0 }
 0x780   : > { %1079 = vadd.xlane.f32.xlu0 %v1078_v55 }
 0x7f3   : > { %v1080_v56 = vpop.xlane.xlu0 %1079 }
 0x7f4   : > { %v1081_v57 = vmul.f32 %v1080_v56, %v1806_v58 }
 0x7f6   : > { %v1082_v59 = vsub.f32 %v1075_v54, %v1081_v57 }
 0x7f8   : > { %v1083_v60 = vmul.f32 %v1082_v59, %v1082_v59 }
 0x7fa   : > { %v1084_v61 = vsel %vm554_vm1, %v1083_v60, 0.0 }
 0x7fb   : > { %1085 = vadd.xlane.f32.xlu0 %v1084_v61 }
 0x86e   : > { %v1086_v62 = vpop.xlane.xlu0 %1085 }
 0x86f   : > { %v1087_v3 = vmul.f32 %v1086_v62, %v1806_v58  ;;  %v1407_v58 = vld [vmem:[%s1958_s22] ss:$0 sm:$0xff] }
 0x871   : > { %v1088_v63 = vadd.f32 1e-05, %v1087_v3 }
 0x873   : > { %1408 = vrsqrt.f32 %v1088_v63  ;;  %vm1095_vm2 = vweird.f32 %v1088_v63 }
 0x879   : > { %v1409_v0 = vpop.eup %1408 }
 0x87a   : > { %v1090_v1 = vmul.f32 %v1409_v0, %v1088_v63  ;;  %vm1096_vm0 = vweird.f32 %v1409_v0 }
 0x87b   : > { %vm1097_vm3 = vmor %vm1095_vm2, %vm1096_vm0 }
 0x87c   : > { %v1091_v2 = vmul.f32 %v1409_v0, %v1090_v1 }
 0x87e   : > { %v1092_v4 = vmul.f32 0.5, %v1091_v2 }
 0x880   : > { %v1093_v5 = vsub.f32 1.5, %v1092_v4 }
 0x882   : > { %v1094_v6 = vmul.f32 %v1409_v0, %v1093_v5 }
 0x884   : > { %v1098_v8 = vsel %vm1097_vm3, %v1409_v0, %v1094_v6 }
 0x885   : > { %v1099_v10 = vmul.f32 %v1098_v8, %v1082_v59 }
 0x887   : > { %v1103_v11 = vmul.f32 %v1406_v7, %v1099_v10 }
 0x889   : > { %v1107_v12 = vadd.f32 %v1407_v58, %v1103_v11 }
 0x88b   : > { %1108 = vst.msk [vmem:[%s1730_s12] sm:$0xff] %vm554_vm1, %v1107_v12 }
 0x88c PF: > { %s1959_s28 = sld [smem:[#allocation14_spill]]  ;;  %s1122_s14 = sshll.u32 %s1730_s12, 4  ;;  %s1123_s14 = int_to_ptr.vmem [resolvable:$true] %s1122_s14 }
 0x88d   : > { %s1961_s13 = sld [smem:[#allocation27_spill]]  ;;  %s1110_s8 = scalar_lea.sflag [#allocation9], %s1722_s30 }
 0x892   : > { %s1270_s17 = sshll.u32 %s1959_s28, 3 }
 0x893   : > { %s1120_s21 = scalar_lea.hbm %s1961_s13, %s1270_s17  ;;  %s1460_s28 = scalar_lea.hbm %s1961_s13, 16 }
 0x894   : > { %s1124_s11 = sshll.u32 %s1120_s21, 4  ;;  %s1125_s11 = int_to_ptr.hbm [resolvable:$true] %s1124_s11 }
 0x895   : > { %s1454_s15 = sshra.s32 %s1125_s11, 4  ;;  %s1455_s15 = int_to_ptr.hbm [resolvable:$true] %s1454_s15 }
 0x896   : > { %s1456_s22 = scalar_lea.hbm %s1455_s15, 8  ;;  %p1461_p9 = scmp.lt.s32.totalorder %s1455_s15, %s1961_s13 }
 0x897   : > { %p1457_p6 = scmp.ne.s32.totalorder %s1455_s15, %s1456_s22  ;;  %p1462_p12 = scmp.lt.s32.totalorder %s1460_s28, %s1456_s22 }
 0x899   : > { %p1458_p7 = pnand %p1457_p6, %p1698_p10  ;;  %p1463_p13 = por %p1462_p12, %p1461_p9 }
 0x89b   : > { %p1459_p8 = pneg %p1458_p7 }
 0x89d   : > { %p1464_p0 = pnand %p1463_p13, %p1459_p8 }
 0x89f   : > { %1467 = shalt.err (!%p1464_p0)
}
 0x8a0   : > { %1285 = dma.vmem_to_hbm [thread:$0]  (%p1698_p10), %s1123_s14, 128, %s1125_s11, %s1110_s8  }
 0x8a1 PF: > { %s1962_s30 = sld [smem:[#allocation13_spill]]  ;;  %p1296_p1 = scmp.ge.s32.totalorder %s1538_s25, 2 }
 0x8a3   : > { %p1292_p2 = pnand %p1296_p1, %p1704_p11 }
 0x8a5   : > { %p1293_p4 = pneg %p1292_p2 }
 0x8a7   : > { %s1136_s12 = sand.u32 1, %s1962_s30  }
 0x8a8   : > { %s1137_s0 = scalar_lea.sflag [#allocation9], %s1136_s12 }
 0x8a9   : > { %1505 = dma.done.wait (%p1293_p4), %s1137_s0, 128  }
 0x8aa   : > { %1507 = vsyncadd (%p1293_p4), %s1137_s0, 4294967168  ;;  %s31_s25 = sadd.s32 1, %s1538_s25   ;;  %s1963_s21 = sld [smem:[#allocation15_spill]] }
 0x8ab   : > { %p28_p3 = scmp.ge.s32.totalorder %s31_s25, 6   ;;  %s1964_s23 = sld [smem:[#allocation16_spill]] }
 0x8ac   : > { %s1965_s18 = smov %s1514_s19  ;;  %s1966_s19 = smov %s1518_s20 }
 0x8ad   : > { %s1967_s20 = smov %s1711_s27  ;;  %s1968_s22 = smov %s1534_s24 }
 0x8ae   : > { %s1969_s24 = smov %s1975_s29  ;;  %30 = sbr.rel (!%p28_p3) target bundleno = 18 (0x12), region = 142 }
 0x8b3   :  { %1143 = vsyncpa [#allocation8], 1 }
 0x8b4   :  { %1145 = vsyncpa [#allocation8 + $0x1], 1 }
 0x8b5   :  { %1146 = vsyncpa [#allocation9], 1 }
 0x8b6   :  { %1148 = vsyncpa [#allocation9 + $0x1], 1 }

</bundles_post_ra>
